<compile_context>
chip_gen: v5e
topology: v5e:2x2
jax: 0.10.0
libtpu: 0.0.40
codegen_flags: <defaults>
</compile_context>

<pallas_src>
import functools

import jax
import jax.numpy as jnp
from jax.experimental import pallas as pl
from jax.experimental.pallas import tpu as pltpu  # noqa: F401  (kept for TPU-specific tuning hooks)


# ----------------------------------------------------------------------------
# Fused Pallas kernel (built per layer-count / sizes)
# ----------------------------------------------------------------------------
def _make_fused_kernel(num_lstm_layers, num_fc_layers, T, B, H):
    """Builds the fused forward kernel for the given layer counts / sizes."""

    def kernel(*refs):
        # Parse refs: inputs..., output.
        idx = 0
        x_ref = refs[idx]; idx += 1                       # (T*B, I) time-major
        lstm_refs = []
        for _ in range(num_lstm_layers):                  # (w_ih, w_hh, b)
            lstm_refs.append((refs[idx], refs[idx + 1], refs[idx + 2]))
            idx += 3
        fc_refs = []
        for _ in range(num_fc_layers):                    # (w, b)
            fc_refs.append((refs[idx], refs[idx + 1]))
            idx += 2
        out_ref = refs[idx]                               # (B, out_feat)

        f32 = jnp.float32

        # Lane mask selecting the cell-candidate ("g") gate columns.
        # Hoisted out of the time loop (broadcasts are not CSE'd by JAX).
        lane = jax.lax.broadcasted_iota(jnp.int32, (B, 4 * H), 1)
        g_mask = jnp.logical_and(lane >= 2 * H, lane < 3 * H)

        # Hoist all weight / bias loads out of the time loop.
        w_hh = [lstm_refs[l][1][...] for l in range(num_lstm_layers)]
        w_ih = [None] + [lstm_refs[l][0][...] for l in range(1, num_lstm_layers)]
        bias = [None] + [lstm_refs[l][2][...] for l in range(1, num_lstm_layers)]

        # Layer-0 input->gate projection for ALL time steps, bias folded in:
        # one (T*B, I) x (I, 4H) matmul off the serial recurrence path.
        w_ih0, _, b0 = lstm_refs[0]
        xw0 = jnp.dot(x_ref[...].astype(f32), w_ih0[...],
                      preferred_element_type=f32) + b0[...]     # (T*B, 4H)

        def lstm_cell(gates, c_prev):
            # One full-tile sigmoid + one full-tile tanh, blended with the
            # lane mask (PyTorch gate order i, f, g, o).
            act = jnp.where(g_mask, jnp.tanh(gates), jax.nn.sigmoid(gates))
            i_g = act[:, 0 * H:1 * H]
            f_g = act[:, 1 * H:2 * H]
            g_g = act[:, 2 * H:3 * H]
            o_g = act[:, 3 * H:4 * H]
            c_new = f_g * c_prev + i_g * g_g
            h_new = o_g * jnp.tanh(c_new)
            return h_new, c_new

        h = [jnp.zeros((B, H), f32) for _ in range(num_lstm_layers)]
        c = [jnp.zeros((B, H), f32) for _ in range(num_lstm_layers)]

        # Single fused (unrolled, T static) time loop over ALL LSTM layers.
        for t in range(T):
            # Layer 0: only the recurrent dot sits on the serial path.
            gates = xw0[t * B:(t + 1) * B, :] + jnp.dot(
                h[0], w_hh[0], preferred_element_type=f32)      # (B, 4H)
            h[0], c[0] = lstm_cell(gates, c[0])
            # Upper layers: input projection of the fresh h from the layer
            # below + recurrent dot (the latter is independent of h_below and
            # can issue early).
            for l in range(1, num_lstm_layers):
                gates = (
                    jnp.dot(h[l - 1], w_ih[l], preferred_element_type=f32)
                    + jnp.dot(h[l], w_hh[l], preferred_element_type=f32)
                    + bias[l]
                )
                h[l], c[l] = lstm_cell(gates, c[l])

        # FC head applied to the last layer's final hidden state only
        # (== hidden[-1, :, :] in the PyTorch module).
        pred = h[num_lstm_layers - 1]                           # (B, H)
        for (w_ref, b_ref) in fc_refs:
            pred = (
                jnp.dot(pred, w_ref[...], preferred_element_type=f32)
                + b_ref[...]
            )
        out_ref[...] = pred.astype(out_ref.dtype)

    return kernel


# ----------------------------------------------------------------------------
# Wrapper
# ----------------------------------------------------------------------------
@functools.partial(jax.jit, static_argnames=("out_len", "output_size"))
def rnn_module_forward(x, lstm_params, fc_params, out_len, output_size):
    """Pallas implementation of _RNNModule.forward (name='LSTM').

    x: (batch, seq_len, input_size)  ->  (batch, out_len, output_size)
    """
    B, T, I = x.shape
    H = lstm_params[0][1].shape[0]
    out_feat = fc_params[-1][0].shape[1]

    # One-time, tiny layout change outside the kernel so that inside the
    # kernel time step t occupies the contiguous rows [t*B, (t+1)*B).
    x2d = jnp.transpose(x, (1, 0, 2)).reshape(T * B, I)

    flat_inputs = [x2d]
    for (w_ih, w_hh, b) in lstm_params:
        flat_inputs += [w_ih, w_hh, b]
    for (w, b) in fc_params:
        flat_inputs += [w, b]

    kernel = _make_fused_kernel(len(lstm_params), len(fc_params), T, B, H)
    pred = pl.pallas_call(
        kernel,
        out_shape=jax.ShapeDtypeStruct((B, out_feat), x.dtype),
    )(*flat_inputs)
    # TODO(synk): training-mode dropout between LSTM layers is not implemented
    # (module is instantiated with dropout=0.0, so it is a no-op at inference).
    return pred.reshape(B, out_len, output_size)


# ----------------------------------------------------------------------------
# Pure-JAX reference (for a correctness check)
# ----------------------------------------------------------------------------
def rnn_module_reference(x, lstm_params, fc_params, out_len, output_size):
    batch_size = x.shape[0]
    h_seq = jnp.transpose(x, (1, 0, 2))
    for (w_ih, w_hh, b) in lstm_params:
        B = h_seq.shape[1]
        H = w_hh.shape[0]

        def step(carry, x_t, w_ih=w_ih, w_hh=w_hh, b=b, H=H):
            h, c = carry
            gates = x_t @ w_ih + h @ w_hh + b[0]
            i_g = jax.nn.sigmoid(gates[:, 0 * H:1 * H])
            f_g = jax.nn.sigmoid(gates[:, 1 * H:2 * H])
            g_g = jnp.tanh(gates[:, 2 * H:3 * H])
            o_g = jax.nn.sigmoid(gates[:, 3 * H:4 * H])
            c = f_g * c + i_g * g_g
            h = o_g * jnp.tanh(c)
            return (h, c), h

        init = (jnp.zeros((B, H), jnp.float32), jnp.zeros((B, H), jnp.float32))
        _, h_seq = jax.lax.scan(step, init, h_seq)
    pred = h_seq[-1]
    for (w, b) in fc_params:
        pred = pred @ w + b[0]
    return pred.reshape(batch_size, out_len, output_size)


# ----------------------------------------------------------------------------
# Deterministic parameter construction (PyTorch-style shapes)
# ----------------------------------------------------------------------------
def init_params(key, input_size, hidden_dim, num_layers, num_layers_out_fc,
                out_len, output_size):
    k = 1.0 / jnp.sqrt(hidden_dim)
    lstm_params = []
    in_dim = input_size
    for _ in range(num_layers):
        key, k1, k2, k3, k4 = jax.random.split(key, 5)
        # PyTorch stores weight_ih as (4H, in); we keep the transpose (in, 4H).
        w_ih = jax.random.uniform(k1, (in_dim, 4 * hidden_dim), jnp.float32, -k, k)
        w_hh = jax.random.uniform(k2, (hidden_dim, 4 * hidden_dim), jnp.float32, -k, k)
        b_ih = jax.random.uniform(k3, (1, 4 * hidden_dim), jnp.float32, -k, k)
        b_hh = jax.random.uniform(k4, (1, 4 * hidden_dim), jnp.float32, -k, k)
        lstm_params.append((w_ih, w_hh, b_ih + b_hh))
        in_dim = hidden_dim

    fc_params = []
    last = hidden_dim
    for feat in list(num_layers_out_fc) + [out_len * output_size]:
        key, k1, k2 = jax.random.split(key, 3)
        kb = 1.0 / jnp.sqrt(last)
        w = jax.random.uniform(k1, (last, feat), jnp.float32, -kb, kb)
        b = jax.random.uniform(k2, (1, feat), jnp.float32, -kb, kb)
        fc_params.append((w, b))
        last = feat
    return lstm_params, fc_params


# ----------------------------------------------------------------------------
if __name__ == "__main__":
    # Module hyperparameters (small, consistent with the PyTorch __init__).
    name = "LSTM"
    input_size = 4
    hidden_dim = 32
    num_layers = 2
    output_length = 3
    output_size = 2
    num_layers_out_fc = [16]
    # dropout=0.0 -> no dropout at inference.

    batch = 2
    seq_len = 8

    key = jax.random.PRNGKey(0)
    key, xkey = jax.random.split(key)
    x = jax.random.normal(xkey, (batch, seq_len, input_size), jnp.float32)

    lstm_params, fc_params = init_params(
        key, input_size, hidden_dim, num_layers, num_layers_out_fc,
        output_length, output_size)

    y = rnn_module_forward(x, lstm_params, fc_params, output_length, output_size)
    y = jax.block_until_ready(y)
    assert y.shape == (batch, output_length, output_size)

    y_ref = rnn_module_reference(x, lstm_params, fc_params, output_length,
                                 output_size)
    assert jnp.allclose(y, y_ref, atol=1e-5, rtol=1e-5), "mismatch vs reference"

    print("KERNEL_OK")
</pallas_src>

<mosaic_0001>
module attributes {stable_mosaic.version = 11 : i64} {
  func.func @kernel(%arg0: memref<16x4xf32, #tpu.memory_space<vmem>>, %arg1: memref<4x128xf32, #tpu.memory_space<vmem>>, %arg2: memref<32x128xf32, #tpu.memory_space<vmem>>, %arg3: memref<1x128xf32, #tpu.memory_space<vmem>>, %arg4: memref<32x128xf32, #tpu.memory_space<vmem>>, %arg5: memref<32x128xf32, #tpu.memory_space<vmem>>, %arg6: memref<1x128xf32, #tpu.memory_space<vmem>>, %arg7: memref<32x16xf32, #tpu.memory_space<vmem>>, %arg8: memref<1x16xf32, #tpu.memory_space<vmem>>, %arg9: memref<16x6xf32, #tpu.memory_space<vmem>>, %arg10: memref<1x6xf32, #tpu.memory_space<vmem>>, %arg11: memref<2x6xf32, #tpu.memory_space<vmem>>) attributes {dimension_semantics = [], scalar_prefetch = 0 : i64, scratch_operands = 0 : i64, tpu.core_type = #tpu.core_type<tc>} {
    %0 = tpu.iota {dimensions = array<i32: 1>} : vector<2x128xi32>
    %c64_i32 = arith.constant 64 : i32
    %1 = vector.broadcast %c64_i32 : i32 to vector<2x128xi32>
    %2 = arith.cmpi sge, %0, %1 : vector<2x128xi32>
    %c96_i32 = arith.constant 96 : i32
    %3 = vector.broadcast %c96_i32 : i32 to vector<2x128xi32>
    %4 = arith.cmpi slt, %0, %3 : vector<2x128xi32>
    %5 = arith.andi %2, %4 : vector<2x128xi1>
    %c0 = arith.constant 0 : index
    %c0_0 = arith.constant 0 : index
    %6 = vector.load %arg2[%c0, %c0_0] : memref<32x128xf32, #tpu.memory_space<vmem>>, vector<32x128xf32>
    %c0_1 = arith.constant 0 : index
    %c0_2 = arith.constant 0 : index
    %7 = vector.load %arg5[%c0_1, %c0_2] : memref<32x128xf32, #tpu.memory_space<vmem>>, vector<32x128xf32>
    %c0_3 = arith.constant 0 : index
    %c0_4 = arith.constant 0 : index
    %8 = vector.load %arg4[%c0_3, %c0_4] : memref<32x128xf32, #tpu.memory_space<vmem>>, vector<32x128xf32>
    %c0_5 = arith.constant 0 : index
    %c0_6 = arith.constant 0 : index
    %9 = vector.load %arg6[%c0_5, %c0_6] : memref<1x128xf32, #tpu.memory_space<vmem>>, vector<1x128xf32>
    %c0_7 = arith.constant 0 : index
    %c0_8 = arith.constant 0 : index
    %10 = vector.load %arg0[%c0_7, %c0_8] : memref<16x4xf32, #tpu.memory_space<vmem>>, vector<16x4xf32>
    %c0_9 = arith.constant 0 : index
    %c0_10 = arith.constant 0 : index
    %11 = vector.load %arg1[%c0_9, %c0_10] : memref<4x128xf32, #tpu.memory_space<vmem>>, vector<4x128xf32>
    %cst = arith.constant dense<0.000000e+00> : vector<16x128xf32>
    %12 = tpu.matmul %10, %11, %cst {dimension_numbers = #tpu.dot_dimension_numbers<[1], [0], [0], [1], [0, 0, 1, 1], [], []>} : vector<16x4xf32>, vector<4x128xf32>, vector<16x128xf32> -> vector<16x128xf32>
    %c0_11 = arith.constant 0 : index
    %c0_12 = arith.constant 0 : index
    %13 = vector.load %arg3[%c0_11, %c0_12] : memref<1x128xf32, #tpu.memory_space<vmem>>, vector<1x128xf32>
    %14 = vector.broadcast %13 : vector<1x128xf32> to vector<16x128xf32>
    %15 = arith.addf %12, %14 : vector<16x128xf32>
    %cst_13 = arith.constant 0.000000e+00 : f32
    %16 = vector.broadcast %cst_13 : f32 to vector<2x32xf32>
    %cst_14 = arith.constant 0.000000e+00 : f32
    %17 = vector.broadcast %cst_14 : f32 to vector<2x32xf32>
    %cst_15 = arith.constant 0.000000e+00 : f32
    %18 = vector.broadcast %cst_15 : f32 to vector<2x32xf32>
    %cst_16 = arith.constant 0.000000e+00 : f32
    %19 = vector.broadcast %cst_16 : f32 to vector<2x32xf32>
    %20 = vector.extract_strided_slice %15 {offsets = [0, 0], sizes = [2, 128], strides = [1, 1]} : vector<16x128xf32> to vector<2x128xf32>
    %cst_17 = arith.constant dense<0.000000e+00> : vector<2x128xf32>
    %21 = tpu.matmul %16, %6, %cst_17 {dimension_numbers = #tpu.dot_dimension_numbers<[1], [0], [0], [1], [0, 0, 1, 1], [], []>} : vector<2x32xf32>, vector<32x128xf32>, vector<2x128xf32> -> vector<2x128xf32>
    %22 = arith.addf %20, %21 : vector<2x128xf32>
    %23 = math.tanh %22 : vector<2x128xf32>
    %24 = arith.negf %22 : vector<2x128xf32>
    %25 = math.exp %24 : vector<2x128xf32>
    %cst_18 = arith.constant 1.000000e+00 : f32
    %26 = vector.broadcast %cst_18 : f32 to vector<2x128xf32>
    %27 = arith.addf %26, %25 : vector<2x128xf32>
    %28 = arith.divf %26, %27 : vector<2x128xf32>
    %29 = arith.select %5, %23, %28 : vector<2x128xi1>, vector<2x128xf32>
    %30 = vector.extract_strided_slice %29 {offsets = [0, 0], sizes = [2, 32], strides = [1, 1]} : vector<2x128xf32> to vector<2x32xf32>
    %31 = vector.extract_strided_slice %29 {offsets = [0, 32], sizes = [2, 32], strides = [1, 1]} : vector<2x128xf32> to vector<2x32xf32>
    %32 = vector.extract_strided_slice %29 {offsets = [0, 64], sizes = [2, 32], strides = [1, 1]} : vector<2x128xf32> to vector<2x32xf32>
    %33 = vector.extract_strided_slice %29 {offsets = [0, 96], sizes = [2, 32], strides = [1, 1]} : vector<2x128xf32> to vector<2x32xf32>
    %34 = arith.mulf %31, %18 : vector<2x32xf32>
    %35 = arith.mulf %30, %32 : vector<2x32xf32>
    %36 = arith.addf %34, %35 : vector<2x32xf32>
    %37 = math.tanh %36 : vector<2x32xf32>
    %38 = arith.mulf %33, %37 : vector<2x32xf32>
    %cst_19 = arith.constant dense<0.000000e+00> : vector<2x128xf32>
    %39 = tpu.matmul %38, %8, %cst_19 {dimension_numbers = #tpu.dot_dimension_numbers<[1], [0], [0], [1], [0, 0, 1, 1], [], []>} : vector<2x32xf32>, vector<32x128xf32>, vector<2x128xf32> -> vector<2x128xf32>
    %cst_20 = arith.constant dense<0.000000e+00> : vector<2x128xf32>
    %40 = tpu.matmul %17, %7, %cst_20 {dimension_numbers = #tpu.dot_dimension_numbers<[1], [0], [0], [1], [0, 0, 1, 1], [], []>} : vector<2x32xf32>, vector<32x128xf32>, vector<2x128xf32> -> vector<2x128xf32>
    %41 = arith.addf %39, %40 : vector<2x128xf32>
    %42 = vector.broadcast %9 : vector<1x128xf32> to vector<2x128xf32>
    %43 = arith.addf %41, %42 : vector<2x128xf32>
    %44 = math.tanh %43 : vector<2x128xf32>
    %45 = arith.negf %43 : vector<2x128xf32>
    %46 = math.exp %45 : vector<2x128xf32>
    %cst_21 = arith.constant 1.000000e+00 : f32
    %47 = vector.broadcast %cst_21 : f32 to vector<2x128xf32>
    %48 = arith.addf %47, %46 : vector<2x128xf32>
    %49 = arith.divf %47, %48 : vector<2x128xf32>
    %50 = arith.select %5, %44, %49 : vector<2x128xi1>, vector<2x128xf32>
    %51 = vector.extract_strided_slice %50 {offsets = [0, 0], sizes = [2, 32], strides = [1, 1]} : vector<2x128xf32> to vector<2x32xf32>
    %52 = vector.extract_strided_slice %50 {offsets = [0, 32], sizes = [2, 32], strides = [1, 1]} : vector<2x128xf32> to vector<2x32xf32>
    %53 = vector.extract_strided_slice %50 {offsets = [0, 64], sizes = [2, 32], strides = [1, 1]} : vector<2x128xf32> to vector<2x32xf32>
    %54 = vector.extract_strided_slice %50 {offsets = [0, 96], sizes = [2, 32], strides = [1, 1]} : vector<2x128xf32> to vector<2x32xf32>
    %55 = arith.mulf %52, %19 : vector<2x32xf32>
    %56 = arith.mulf %51, %53 : vector<2x32xf32>
    %57 = arith.addf %55, %56 : vector<2x32xf32>
    %58 = math.tanh %57 : vector<2x32xf32>
    %59 = arith.mulf %54, %58 : vector<2x32xf32>
    %60 = vector.extract_strided_slice %15 {offsets = [2, 0], sizes = [2, 128], strides = [1, 1]} : vector<16x128xf32> to vector<2x128xf32>
    %cst_22 = arith.constant dense<0.000000e+00> : vector<2x128xf32>
    %61 = tpu.matmul %38, %6, %cst_22 {dimension_numbers = #tpu.dot_dimension_numbers<[1], [0], [0], [1], [0, 0, 1, 1], [], []>} : vector<2x32xf32>, vector<32x128xf32>, vector<2x128xf32> -> vector<2x128xf32>
    %62 = arith.addf %60, %61 : vector<2x128xf32>
    %63 = math.tanh %62 : vector<2x128xf32>
    %64 = arith.negf %62 : vector<2x128xf32>
    %65 = math.exp %64 : vector<2x128xf32>
    %cst_23 = arith.constant 1.000000e+00 : f32
    %66 = vector.broadcast %cst_23 : f32 to vector<2x128xf32>
    %67 = arith.addf %66, %65 : vector<2x128xf32>
    %68 = arith.divf %66, %67 : vector<2x128xf32>
    %69 = arith.select %5, %63, %68 : vector<2x128xi1>, vector<2x128xf32>
    %70 = vector.extract_strided_slice %69 {offsets = [0, 0], sizes = [2, 32], strides = [1, 1]} : vector<2x128xf32> to vector<2x32xf32>
    %71 = vector.extract_strided_slice %69 {offsets = [0, 32], sizes = [2, 32], strides = [1, 1]} : vector<2x128xf32> to vector<2x32xf32>
    %72 = vector.extract_strided_slice %69 {offsets = [0, 64], sizes = [2, 32], strides = [1, 1]} : vector<2x128xf32> to vector<2x32xf32>
    %73 = vector.extract_strided_slice %69 {offsets = [0, 96], sizes = [2, 32], strides = [1, 1]} : vector<2x128xf32> to vector<2x32xf32>
    %74 = arith.mulf %71, %36 : vector<2x32xf32>
    %75 = arith.mulf %70, %72 : vector<2x32xf32>
    %76 = arith.addf %74, %75 : vector<2x32xf32>
    %77 = math.tanh %76 : vector<2x32xf32>
    %78 = arith.mulf %73, %77 : vector<2x32xf32>
    %cst_24 = arith.constant dense<0.000000e+00> : vector<2x128xf32>
    %79 = tpu.matmul %78, %8, %cst_24 {dimension_numbers = #tpu.dot_dimension_numbers<[1], [0], [0], [1], [0, 0, 1, 1], [], []>} : vector<2x32xf32>, vector<32x128xf32>, vector<2x128xf32> -> vector<2x128xf32>
    %cst_25 = arith.constant dense<0.000000e+00> : vector<2x128xf32>
    %80 = tpu.matmul %59, %7, %cst_25 {dimension_numbers = #tpu.dot_dimension_numbers<[1], [0], [0], [1], [0, 0, 1, 1], [], []>} : vector<2x32xf32>, vector<32x128xf32>, vector<2x128xf32> -> vector<2x128xf32>
    %81 = arith.addf %79, %80 : vector<2x128xf32>
    %82 = vector.broadcast %9 : vector<1x128xf32> to vector<2x128xf32>
    %83 = arith.addf %81, %82 : vector<2x128xf32>
    %84 = math.tanh %83 : vector<2x128xf32>
    %85 = arith.negf %83 : vector<2x128xf32>
    %86 = math.exp %85 : vector<2x128xf32>
    %cst_26 = arith.constant 1.000000e+00 : f32
    %87 = vector.broadcast %cst_26 : f32 to vector<2x128xf32>
    %88 = arith.addf %87, %86 : vector<2x128xf32>
    %89 = arith.divf %87, %88 : vector<2x128xf32>
    %90 = arith.select %5, %84, %89 : vector<2x128xi1>, vector<2x128xf32>
    %91 = vector.extract_strided_slice %90 {offsets = [0, 0], sizes = [2, 32], strides = [1, 1]} : vector<2x128xf32> to vector<2x32xf32>
    %92 = vector.extract_strided_slice %90 {offsets = [0, 32], sizes = [2, 32], strides = [1, 1]} : vector<2x128xf32> to vector<2x32xf32>
    %93 = vector.extract_strided_slice %90 {offsets = [0, 64], sizes = [2, 32], strides = [1, 1]} : vector<2x128xf32> to vector<2x32xf32>
    %94 = vector.extract_strided_slice %90 {offsets = [0, 96], sizes = [2, 32], strides = [1, 1]} : vector<2x128xf32> to vector<2x32xf32>
    %95 = arith.mulf %92, %57 : vector<2x32xf32>
    %96 = arith.mulf %91, %93 : vector<2x32xf32>
    %97 = arith.addf %95, %96 : vector<2x32xf32>
    %98 = math.tanh %97 : vector<2x32xf32>
    %99 = arith.mulf %94, %98 : vector<2x32xf32>
    %100 = vector.extract_strided_slice %15 {offsets = [4, 0], sizes = [2, 128], strides = [1, 1]} : vector<16x128xf32> to vector<2x128xf32>
    %cst_27 = arith.constant dense<0.000000e+00> : vector<2x128xf32>
    %101 = tpu.matmul %78, %6, %cst_27 {dimension_numbers = #tpu.dot_dimension_numbers<[1], [0], [0], [1], [0, 0, 1, 1], [], []>} : vector<2x32xf32>, vector<32x128xf32>, vector<2x128xf32> -> vector<2x128xf32>
    %102 = arith.addf %100, %101 : vector<2x128xf32>
    %103 = math.tanh %102 : vector<2x128xf32>
    %104 = arith.negf %102 : vector<2x128xf32>
    %105 = math.exp %104 : vector<2x128xf32>
    %cst_28 = arith.constant 1.000000e+00 : f32
    %106 = vector.broadcast %cst_28 : f32 to vector<2x128xf32>
    %107 = arith.addf %106, %105 : vector<2x128xf32>
    %108 = arith.divf %106, %107 : vector<2x128xf32>
    %109 = arith.select %5, %103, %108 : vector<2x128xi1>, vector<2x128xf32>
    %110 = vector.extract_strided_slice %109 {offsets = [0, 0], sizes = [2, 32], strides = [1, 1]} : vector<2x128xf32> to vector<2x32xf32>
    %111 = vector.extract_strided_slice %109 {offsets = [0, 32], sizes = [2, 32], strides = [1, 1]} : vector<2x128xf32> to vector<2x32xf32>
    %112 = vector.extract_strided_slice %109 {offsets = [0, 64], sizes = [2, 32], strides = [1, 1]} : vector<2x128xf32> to vector<2x32xf32>
    %113 = vector.extract_strided_slice %109 {offsets = [0, 96], sizes = [2, 32], strides = [1, 1]} : vector<2x128xf32> to vector<2x32xf32>
    %114 = arith.mulf %111, %76 : vector<2x32xf32>
    %115 = arith.mulf %110, %112 : vector<2x32xf32>
    %116 = arith.addf %114, %115 : vector<2x32xf32>
    %117 = math.tanh %116 : vector<2x32xf32>
    %118 = arith.mulf %113, %117 : vector<2x32xf32>
    %cst_29 = arith.constant dense<0.000000e+00> : vector<2x128xf32>
    %119 = tpu.matmul %118, %8, %cst_29 {dimension_numbers = #tpu.dot_dimension_numbers<[1], [0], [0], [1], [0, 0, 1, 1], [], []>} : vector<2x32xf32>, vector<32x128xf32>, vector<2x128xf32> -> vector<2x128xf32>
    %cst_30 = arith.constant dense<0.000000e+00> : vector<2x128xf32>
    %120 = tpu.matmul %99, %7, %cst_30 {dimension_numbers = #tpu.dot_dimension_numbers<[1], [0], [0], [1], [0, 0, 1, 1], [], []>} : vector<2x32xf32>, vector<32x128xf32>, vector<2x128xf32> -> vector<2x128xf32>
    %121 = arith.addf %119, %120 : vector<2x128xf32>
    %122 = vector.broadcast %9 : vector<1x128xf32> to vector<2x128xf32>
    %123 = arith.addf %121, %122 : vector<2x128xf32>
    %124 = math.tanh %123 : vector<2x128xf32>
    %125 = arith.negf %123 : vector<2x128xf32>
    %126 = math.exp %125 : vector<2x128xf32>
    %cst_31 = arith.constant 1.000000e+00 : f32
    %127 = vector.broadcast %cst_31 : f32 to vector<2x128xf32>
    %128 = arith.addf %127, %126 : vector<2x128xf32>
    %129 = arith.divf %127, %128 : vector<2x128xf32>
    %130 = arith.select %5, %124, %129 : vector<2x128xi1>, vector<2x128xf32>
    %131 = vector.extract_strided_slice %130 {offsets = [0, 0], sizes = [2, 32], strides = [1, 1]} : vector<2x128xf32> to vector<2x32xf32>
    %132 = vector.extract_strided_slice %130 {offsets = [0, 32], sizes = [2, 32], strides = [1, 1]} : vector<2x128xf32> to vector<2x32xf32>
    %133 = vector.extract_strided_slice %130 {offsets = [0, 64], sizes = [2, 32], strides = [1, 1]} : vector<2x128xf32> to vector<2x32xf32>
    %134 = vector.extract_strided_slice %130 {offsets = [0, 96], sizes = [2, 32], strides = [1, 1]} : vector<2x128xf32> to vector<2x32xf32>
    %135 = arith.mulf %132, %97 : vector<2x32xf32>
    %136 = arith.mulf %131, %133 : vector<2x32xf32>
    %137 = arith.addf %135, %136 : vector<2x32xf32>
    %138 = math.tanh %137 : vector<2x32xf32>
    %139 = arith.mulf %134, %138 : vector<2x32xf32>
    %140 = vector.extract_strided_slice %15 {offsets = [6, 0], sizes = [2, 128], strides = [1, 1]} : vector<16x128xf32> to vector<2x128xf32>
    %cst_32 = arith.constant dense<0.000000e+00> : vector<2x128xf32>
    %141 = tpu.matmul %118, %6, %cst_32 {dimension_numbers = #tpu.dot_dimension_numbers<[1], [0], [0], [1], [0, 0, 1, 1], [], []>} : vector<2x32xf32>, vector<32x128xf32>, vector<2x128xf32> -> vector<2x128xf32>
    %142 = arith.addf %140, %141 : vector<2x128xf32>
    %143 = math.tanh %142 : vector<2x128xf32>
    %144 = arith.negf %142 : vector<2x128xf32>
    %145 = math.exp %144 : vector<2x128xf32>
    %cst_33 = arith.constant 1.000000e+00 : f32
    %146 = vector.broadcast %cst_33 : f32 to vector<2x128xf32>
    %147 = arith.addf %146, %145 : vector<2x128xf32>
    %148 = arith.divf %146, %147 : vector<2x128xf32>
    %149 = arith.select %5, %143, %148 : vector<2x128xi1>, vector<2x128xf32>
    %150 = vector.extract_strided_slice %149 {offsets = [0, 0], sizes = [2, 32], strides = [1, 1]} : vector<2x128xf32> to vector<2x32xf32>
    %151 = vector.extract_strided_slice %149 {offsets = [0, 32], sizes = [2, 32], strides = [1, 1]} : vector<2x128xf32> to vector<2x32xf32>
    %152 = vector.extract_strided_slice %149 {offsets = [0, 64], sizes = [2, 32], strides = [1, 1]} : vector<2x128xf32> to vector<2x32xf32>
    %153 = vector.extract_strided_slice %149 {offsets = [0, 96], sizes = [2, 32], strides = [1, 1]} : vector<2x128xf32> to vector<2x32xf32>
    %154 = arith.mulf %151, %116 : vector<2x32xf32>
    %155 = arith.mulf %150, %152 : vector<2x32xf32>
    %156 = arith.addf %154, %155 : vector<2x32xf32>
    %157 = math.tanh %156 : vector<2x32xf32>
    %158 = arith.mulf %153, %157 : vector<2x32xf32>
    %cst_34 = arith.constant dense<0.000000e+00> : vector<2x128xf32>
    %159 = tpu.matmul %158, %8, %cst_34 {dimension_numbers = #tpu.dot_dimension_numbers<[1], [0], [0], [1], [0, 0, 1, 1], [], []>} : vector<2x32xf32>, vector<32x128xf32>, vector<2x128xf32> -> vector<2x128xf32>
    %cst_35 = arith.constant dense<0.000000e+00> : vector<2x128xf32>
    %160 = tpu.matmul %139, %7, %cst_35 {dimension_numbers = #tpu.dot_dimension_numbers<[1], [0], [0], [1], [0, 0, 1, 1], [], []>} : vector<2x32xf32>, vector<32x128xf32>, vector<2x128xf32> -> vector<2x128xf32>
    %161 = arith.addf %159, %160 : vector<2x128xf32>
    %162 = vector.broadcast %9 : vector<1x128xf32> to vector<2x128xf32>
    %163 = arith.addf %161, %162 : vector<2x128xf32>
    %164 = math.tanh %163 : vector<2x128xf32>
    %165 = arith.negf %163 : vector<2x128xf32>
    %166 = math.exp %165 : vector<2x128xf32>
    %cst_36 = arith.constant 1.000000e+00 : f32
    %167 = vector.broadcast %cst_36 : f32 to vector<2x128xf32>
    %168 = arith.addf %167, %166 : vector<2x128xf32>
    %169 = arith.divf %167, %168 : vector<2x128xf32>
    %170 = arith.select %5, %164, %169 : vector<2x128xi1>, vector<2x128xf32>
    %171 = vector.extract_strided_slice %170 {offsets = [0, 0], sizes = [2, 32], strides = [1, 1]} : vector<2x128xf32> to vector<2x32xf32>
    %172 = vector.extract_strided_slice %170 {offsets = [0, 32], sizes = [2, 32], strides = [1, 1]} : vector<2x128xf32> to vector<2x32xf32>
    %173 = vector.extract_strided_slice %170 {offsets = [0, 64], sizes = [2, 32], strides = [1, 1]} : vector<2x128xf32> to vector<2x32xf32>
    %174 = vector.extract_strided_slice %170 {offsets = [0, 96], sizes = [2, 32], strides = [1, 1]} : vector<2x128xf32> to vector<2x32xf32>
    %175 = arith.mulf %172, %137 : vector<2x32xf32>
    %176 = arith.mulf %171, %173 : vector<2x32xf32>
    %177 = arith.addf %175, %176 : vector<2x32xf32>
    %178 = math.tanh %177 : vector<2x32xf32>
    %179 = arith.mulf %174, %178 : vector<2x32xf32>
    %180 = vector.extract_strided_slice %15 {offsets = [8, 0], sizes = [2, 128], strides = [1, 1]} : vector<16x128xf32> to vector<2x128xf32>
    %cst_37 = arith.constant dense<0.000000e+00> : vector<2x128xf32>
    %181 = tpu.matmul %158, %6, %cst_37 {dimension_numbers = #tpu.dot_dimension_numbers<[1], [0], [0], [1], [0, 0, 1, 1], [], []>} : vector<2x32xf32>, vector<32x128xf32>, vector<2x128xf32> -> vector<2x128xf32>
    %182 = arith.addf %180, %181 : vector<2x128xf32>
    %183 = math.tanh %182 : vector<2x128xf32>
    %184 = arith.negf %182 : vector<2x128xf32>
    %185 = math.exp %184 : vector<2x128xf32>
    %cst_38 = arith.constant 1.000000e+00 : f32
    %186 = vector.broadcast %cst_38 : f32 to vector<2x128xf32>
    %187 = arith.addf %186, %185 : vector<2x128xf32>
    %188 = arith.divf %186, %187 : vector<2x128xf32>
    %189 = arith.select %5, %183, %188 : vector<2x128xi1>, vector<2x128xf32>
    %190 = vector.extract_strided_slice %189 {offsets = [0, 0], sizes = [2, 32], strides = [1, 1]} : vector<2x128xf32> to vector<2x32xf32>
    %191 = vector.extract_strided_slice %189 {offsets = [0, 32], sizes = [2, 32], strides = [1, 1]} : vector<2x128xf32> to vector<2x32xf32>
    %192 = vector.extract_strided_slice %189 {offsets = [0, 64], sizes = [2, 32], strides = [1, 1]} : vector<2x128xf32> to vector<2x32xf32>
    %193 = vector.extract_strided_slice %189 {offsets = [0, 96], sizes = [2, 32], strides = [1, 1]} : vector<2x128xf32> to vector<2x32xf32>
    %194 = arith.mulf %191, %156 : vector<2x32xf32>
    %195 = arith.mulf %190, %192 : vector<2x32xf32>
    %196 = arith.addf %194, %195 : vector<2x32xf32>
    %197 = math.tanh %196 : vector<2x32xf32>
    %198 = arith.mulf %193, %197 : vector<2x32xf32>
    %cst_39 = arith.constant dense<0.000000e+00> : vector<2x128xf32>
    %199 = tpu.matmul %198, %8, %cst_39 {dimension_numbers = #tpu.dot_dimension_numbers<[1], [0], [0], [1], [0, 0, 1, 1], [], []>} : vector<2x32xf32>, vector<32x128xf32>, vector<2x128xf32> -> vector<2x128xf32>
    %cst_40 = arith.constant dense<0.000000e+00> : vector<2x128xf32>
    %200 = tpu.matmul %179, %7, %cst_40 {dimension_numbers = #tpu.dot_dimension_numbers<[1], [0], [0], [1], [0, 0, 1, 1], [], []>} : vector<2x32xf32>, vector<32x128xf32>, vector<2x128xf32> -> vector<2x128xf32>
    %201 = arith.addf %199, %200 : vector<2x128xf32>
    %202 = vector.broadcast %9 : vector<1x128xf32> to vector<2x128xf32>
    %203 = arith.addf %201, %202 : vector<2x128xf32>
    %204 = math.tanh %203 : vector<2x128xf32>
    %205 = arith.negf %203 : vector<2x128xf32>
    %206 = math.exp %205 : vector<2x128xf32>
    %cst_41 = arith.constant 1.000000e+00 : f32
    %207 = vector.broadcast %cst_41 : f32 to vector<2x128xf32>
    %208 = arith.addf %207, %206 : vector<2x128xf32>
    %209 = arith.divf %207, %208 : vector<2x128xf32>
    %210 = arith.select %5, %204, %209 : vector<2x128xi1>, vector<2x128xf32>
    %211 = vector.extract_strided_slice %210 {offsets = [0, 0], sizes = [2, 32], strides = [1, 1]} : vector<2x128xf32> to vector<2x32xf32>
    %212 = vector.extract_strided_slice %210 {offsets = [0, 32], sizes = [2, 32], strides = [1, 1]} : vector<2x128xf32> to vector<2x32xf32>
    %213 = vector.extract_strided_slice %210 {offsets = [0, 64], sizes = [2, 32], strides = [1, 1]} : vector<2x128xf32> to vector<2x32xf32>
    %214 = vector.extract_strided_slice %210 {offsets = [0, 96], sizes = [2, 32], strides = [1, 1]} : vector<2x128xf32> to vector<2x32xf32>
    %215 = arith.mulf %212, %177 : vector<2x32xf32>
    %216 = arith.mulf %211, %213 : vector<2x32xf32>
    %217 = arith.addf %215, %216 : vector<2x32xf32>
    %218 = math.tanh %217 : vector<2x32xf32>
    %219 = arith.mulf %214, %218 : vector<2x32xf32>
    %220 = vector.extract_strided_slice %15 {offsets = [10, 0], sizes = [2, 128], strides = [1, 1]} : vector<16x128xf32> to vector<2x128xf32>
    %cst_42 = arith.constant dense<0.000000e+00> : vector<2x128xf32>
    %221 = tpu.matmul %198, %6, %cst_42 {dimension_numbers = #tpu.dot_dimension_numbers<[1], [0], [0], [1], [0, 0, 1, 1], [], []>} : vector<2x32xf32>, vector<32x128xf32>, vector<2x128xf32> -> vector<2x128xf32>
    %222 = arith.addf %220, %221 : vector<2x128xf32>
    %223 = math.tanh %222 : vector<2x128xf32>
    %224 = arith.negf %222 : vector<2x128xf32>
    %225 = math.exp %224 : vector<2x128xf32>
    %cst_43 = arith.constant 1.000000e+00 : f32
    %226 = vector.broadcast %cst_43 : f32 to vector<2x128xf32>
    %227 = arith.addf %226, %225 : vector<2x128xf32>
    %228 = arith.divf %226, %227 : vector<2x128xf32>
    %229 = arith.select %5, %223, %228 : vector<2x128xi1>, vector<2x128xf32>
    %230 = vector.extract_strided_slice %229 {offsets = [0, 0], sizes = [2, 32], strides = [1, 1]} : vector<2x128xf32> to vector<2x32xf32>
    %231 = vector.extract_strided_slice %229 {offsets = [0, 32], sizes = [2, 32], strides = [1, 1]} : vector<2x128xf32> to vector<2x32xf32>
    %232 = vector.extract_strided_slice %229 {offsets = [0, 64], sizes = [2, 32], strides = [1, 1]} : vector<2x128xf32> to vector<2x32xf32>
    %233 = vector.extract_strided_slice %229 {offsets = [0, 96], sizes = [2, 32], strides = [1, 1]} : vector<2x128xf32> to vector<2x32xf32>
    %234 = arith.mulf %231, %196 : vector<2x32xf32>
    %235 = arith.mulf %230, %232 : vector<2x32xf32>
    %236 = arith.addf %234, %235 : vector<2x32xf32>
    %237 = math.tanh %236 : vector<2x32xf32>
    %238 = arith.mulf %233, %237 : vector<2x32xf32>
    %cst_44 = arith.constant dense<0.000000e+00> : vector<2x128xf32>
    %239 = tpu.matmul %238, %8, %cst_44 {dimension_numbers = #tpu.dot_dimension_numbers<[1], [0], [0], [1], [0, 0, 1, 1], [], []>} : vector<2x32xf32>, vector<32x128xf32>, vector<2x128xf32> -> vector<2x128xf32>
    %cst_45 = arith.constant dense<0.000000e+00> : vector<2x128xf32>
    %240 = tpu.matmul %219, %7, %cst_45 {dimension_numbers = #tpu.dot_dimension_numbers<[1], [0], [0], [1], [0, 0, 1, 1], [], []>} : vector<2x32xf32>, vector<32x128xf32>, vector<2x128xf32> -> vector<2x128xf32>
    %241 = arith.addf %239, %240 : vector<2x128xf32>
    %242 = vector.broadcast %9 : vector<1x128xf32> to vector<2x128xf32>
    %243 = arith.addf %241, %242 : vector<2x128xf32>
    %244 = math.tanh %243 : vector<2x128xf32>
    %245 = arith.negf %243 : vector<2x128xf32>
    %246 = math.exp %245 : vector<2x128xf32>
    %cst_46 = arith.constant 1.000000e+00 : f32
    %247 = vector.broadcast %cst_46 : f32 to vector<2x128xf32>
    %248 = arith.addf %247, %246 : vector<2x128xf32>
    %249 = arith.divf %247, %248 : vector<2x128xf32>
    %250 = arith.select %5, %244, %249 : vector<2x128xi1>, vector<2x128xf32>
    %251 = vector.extract_strided_slice %250 {offsets = [0, 0], sizes = [2, 32], strides = [1, 1]} : vector<2x128xf32> to vector<2x32xf32>
    %252 = vector.extract_strided_slice %250 {offsets = [0, 32], sizes = [2, 32], strides = [1, 1]} : vector<2x128xf32> to vector<2x32xf32>
    %253 = vector.extract_strided_slice %250 {offsets = [0, 64], sizes = [2, 32], strides = [1, 1]} : vector<2x128xf32> to vector<2x32xf32>
    %254 = vector.extract_strided_slice %250 {offsets = [0, 96], sizes = [2, 32], strides = [1, 1]} : vector<2x128xf32> to vector<2x32xf32>
    %255 = arith.mulf %252, %217 : vector<2x32xf32>
    %256 = arith.mulf %251, %253 : vector<2x32xf32>
    %257 = arith.addf %255, %256 : vector<2x32xf32>
    %258 = math.tanh %257 : vector<2x32xf32>
    %259 = arith.mulf %254, %258 : vector<2x32xf32>
    %260 = vector.extract_strided_slice %15 {offsets = [12, 0], sizes = [2, 128], strides = [1, 1]} : vector<16x128xf32> to vector<2x128xf32>
    %cst_47 = arith.constant dense<0.000000e+00> : vector<2x128xf32>
    %261 = tpu.matmul %238, %6, %cst_47 {dimension_numbers = #tpu.dot_dimension_numbers<[1], [0], [0], [1], [0, 0, 1, 1], [], []>} : vector<2x32xf32>, vector<32x128xf32>, vector<2x128xf32> -> vector<2x128xf32>
    %262 = arith.addf %260, %261 : vector<2x128xf32>
    %263 = math.tanh %262 : vector<2x128xf32>
    %264 = arith.negf %262 : vector<2x128xf32>
    %265 = math.exp %264 : vector<2x128xf32>
    %cst_48 = arith.constant 1.000000e+00 : f32
    %266 = vector.broadcast %cst_48 : f32 to vector<2x128xf32>
    %267 = arith.addf %266, %265 : vector<2x128xf32>
    %268 = arith.divf %266, %267 : vector<2x128xf32>
    %269 = arith.select %5, %263, %268 : vector<2x128xi1>, vector<2x128xf32>
    %270 = vector.extract_strided_slice %269 {offsets = [0, 0], sizes = [2, 32], strides = [1, 1]} : vector<2x128xf32> to vector<2x32xf32>
    %271 = vector.extract_strided_slice %269 {offsets = [0, 32], sizes = [2, 32], strides = [1, 1]} : vector<2x128xf32> to vector<2x32xf32>
    %272 = vector.extract_strided_slice %269 {offsets = [0, 64], sizes = [2, 32], strides = [1, 1]} : vector<2x128xf32> to vector<2x32xf32>
    %273 = vector.extract_strided_slice %269 {offsets = [0, 96], sizes = [2, 32], strides = [1, 1]} : vector<2x128xf32> to vector<2x32xf32>
    %274 = arith.mulf %271, %236 : vector<2x32xf32>
    %275 = arith.mulf %270, %272 : vector<2x32xf32>
    %276 = arith.addf %274, %275 : vector<2x32xf32>
    %277 = math.tanh %276 : vector<2x32xf32>
    %278 = arith.mulf %273, %277 : vector<2x32xf32>
    %cst_49 = arith.constant dense<0.000000e+00> : vector<2x128xf32>
    %279 = tpu.matmul %278, %8, %cst_49 {dimension_numbers = #tpu.dot_dimension_numbers<[1], [0], [0], [1], [0, 0, 1, 1], [], []>} : vector<2x32xf32>, vector<32x128xf32>, vector<2x128xf32> -> vector<2x128xf32>
    %cst_50 = arith.constant dense<0.000000e+00> : vector<2x128xf32>
    %280 = tpu.matmul %259, %7, %cst_50 {dimension_numbers = #tpu.dot_dimension_numbers<[1], [0], [0], [1], [0, 0, 1, 1], [], []>} : vector<2x32xf32>, vector<32x128xf32>, vector<2x128xf32> -> vector<2x128xf32>
    %281 = arith.addf %279, %280 : vector<2x128xf32>
    %282 = vector.broadcast %9 : vector<1x128xf32> to vector<2x128xf32>
    %283 = arith.addf %281, %282 : vector<2x128xf32>
    %284 = math.tanh %283 : vector<2x128xf32>
    %285 = arith.negf %283 : vector<2x128xf32>
    %286 = math.exp %285 : vector<2x128xf32>
    %cst_51 = arith.constant 1.000000e+00 : f32
    %287 = vector.broadcast %cst_51 : f32 to vector<2x128xf32>
    %288 = arith.addf %287, %286 : vector<2x128xf32>
    %289 = arith.divf %287, %288 : vector<2x128xf32>
    %290 = arith.select %5, %284, %289 : vector<2x128xi1>, vector<2x128xf32>
    %291 = vector.extract_strided_slice %290 {offsets = [0, 0], sizes = [2, 32], strides = [1, 1]} : vector<2x128xf32> to vector<2x32xf32>
    %292 = vector.extract_strided_slice %290 {offsets = [0, 32], sizes = [2, 32], strides = [1, 1]} : vector<2x128xf32> to vector<2x32xf32>
    %293 = vector.extract_strided_slice %290 {offsets = [0, 64], sizes = [2, 32], strides = [1, 1]} : vector<2x128xf32> to vector<2x32xf32>
    %294 = vector.extract_strided_slice %290 {offsets = [0, 96], sizes = [2, 32], strides = [1, 1]} : vector<2x128xf32> to vector<2x32xf32>
    %295 = arith.mulf %292, %257 : vector<2x32xf32>
    %296 = arith.mulf %291, %293 : vector<2x32xf32>
    %297 = arith.addf %295, %296 : vector<2x32xf32>
    %298 = math.tanh %297 : vector<2x32xf32>
    %299 = arith.mulf %294, %298 : vector<2x32xf32>
    %300 = vector.extract_strided_slice %15 {offsets = [14, 0], sizes = [2, 128], strides = [1, 1]} : vector<16x128xf32> to vector<2x128xf32>
    %cst_52 = arith.constant dense<0.000000e+00> : vector<2x128xf32>
    %301 = tpu.matmul %278, %6, %cst_52 {dimension_numbers = #tpu.dot_dimension_numbers<[1], [0], [0], [1], [0, 0, 1, 1], [], []>} : vector<2x32xf32>, vector<32x128xf32>, vector<2x128xf32> -> vector<2x128xf32>
    %302 = arith.addf %300, %301 : vector<2x128xf32>
    %303 = math.tanh %302 : vector<2x128xf32>
    %304 = arith.negf %302 : vector<2x128xf32>
    %305 = math.exp %304 : vector<2x128xf32>
    %cst_53 = arith.constant 1.000000e+00 : f32
    %306 = vector.broadcast %cst_53 : f32 to vector<2x128xf32>
    %307 = arith.addf %306, %305 : vector<2x128xf32>
    %308 = arith.divf %306, %307 : vector<2x128xf32>
    %309 = arith.select %5, %303, %308 : vector<2x128xi1>, vector<2x128xf32>
    %310 = vector.extract_strided_slice %309 {offsets = [0, 0], sizes = [2, 32], strides = [1, 1]} : vector<2x128xf32> to vector<2x32xf32>
    %311 = vector.extract_strided_slice %309 {offsets = [0, 32], sizes = [2, 32], strides = [1, 1]} : vector<2x128xf32> to vector<2x32xf32>
    %312 = vector.extract_strided_slice %309 {offsets = [0, 64], sizes = [2, 32], strides = [1, 1]} : vector<2x128xf32> to vector<2x32xf32>
    %313 = vector.extract_strided_slice %309 {offsets = [0, 96], sizes = [2, 32], strides = [1, 1]} : vector<2x128xf32> to vector<2x32xf32>
    %314 = arith.mulf %311, %276 : vector<2x32xf32>
    %315 = arith.mulf %310, %312 : vector<2x32xf32>
    %316 = arith.addf %314, %315 : vector<2x32xf32>
    %317 = math.tanh %316 : vector<2x32xf32>
    %318 = arith.mulf %313, %317 : vector<2x32xf32>
    %cst_54 = arith.constant dense<0.000000e+00> : vector<2x128xf32>
    %319 = tpu.matmul %318, %8, %cst_54 {dimension_numbers = #tpu.dot_dimension_numbers<[1], [0], [0], [1], [0, 0, 1, 1], [], []>} : vector<2x32xf32>, vector<32x128xf32>, vector<2x128xf32> -> vector<2x128xf32>
    %cst_55 = arith.constant dense<0.000000e+00> : vector<2x128xf32>
    %320 = tpu.matmul %299, %7, %cst_55 {dimension_numbers = #tpu.dot_dimension_numbers<[1], [0], [0], [1], [0, 0, 1, 1], [], []>} : vector<2x32xf32>, vector<32x128xf32>, vector<2x128xf32> -> vector<2x128xf32>
    %321 = arith.addf %319, %320 : vector<2x128xf32>
    %322 = vector.broadcast %9 : vector<1x128xf32> to vector<2x128xf32>
    %323 = arith.addf %321, %322 : vector<2x128xf32>
    %324 = math.tanh %323 : vector<2x128xf32>
    %325 = arith.negf %323 : vector<2x128xf32>
    %326 = math.exp %325 : vector<2x128xf32>
    %cst_56 = arith.constant 1.000000e+00 : f32
    %327 = vector.broadcast %cst_56 : f32 to vector<2x128xf32>
    %328 = arith.addf %327, %326 : vector<2x128xf32>
    %329 = arith.divf %327, %328 : vector<2x128xf32>
    %330 = arith.select %5, %324, %329 : vector<2x128xi1>, vector<2x128xf32>
    %331 = vector.extract_strided_slice %330 {offsets = [0, 0], sizes = [2, 32], strides = [1, 1]} : vector<2x128xf32> to vector<2x32xf32>
    %332 = vector.extract_strided_slice %330 {offsets = [0, 32], sizes = [2, 32], strides = [1, 1]} : vector<2x128xf32> to vector<2x32xf32>
    %333 = vector.extract_strided_slice %330 {offsets = [0, 64], sizes = [2, 32], strides = [1, 1]} : vector<2x128xf32> to vector<2x32xf32>
    %334 = vector.extract_strided_slice %330 {offsets = [0, 96], sizes = [2, 32], strides = [1, 1]} : vector<2x128xf32> to vector<2x32xf32>
    %335 = arith.mulf %332, %297 : vector<2x32xf32>
    %336 = arith.mulf %331, %333 : vector<2x32xf32>
    %337 = arith.addf %335, %336 : vector<2x32xf32>
    %338 = math.tanh %337 : vector<2x32xf32>
    %339 = arith.mulf %334, %338 : vector<2x32xf32>
    %c0_57 = arith.constant 0 : index
    %c0_58 = arith.constant 0 : index
    %340 = vector.load %arg7[%c0_57, %c0_58] : memref<32x16xf32, #tpu.memory_space<vmem>>, vector<32x16xf32>
    %cst_59 = arith.constant dense<0.000000e+00> : vector<2x16xf32>
    %341 = tpu.matmul %339, %340, %cst_59 {dimension_numbers = #tpu.dot_dimension_numbers<[1], [0], [0], [1], [0, 0, 1, 1], [], []>} : vector<2x32xf32>, vector<32x16xf32>, vector<2x16xf32> -> vector<2x16xf32>
    %c0_60 = arith.constant 0 : index
    %c0_61 = arith.constant 0 : index
    %342 = vector.load %arg8[%c0_60, %c0_61] : memref<1x16xf32, #tpu.memory_space<vmem>>, vector<1x16xf32>
    %343 = vector.broadcast %342 : vector<1x16xf32> to vector<2x16xf32>
    %344 = arith.addf %341, %343 : vector<2x16xf32>
    %c0_62 = arith.constant 0 : index
    %c0_63 = arith.constant 0 : index
    %345 = vector.load %arg9[%c0_62, %c0_63] : memref<16x6xf32, #tpu.memory_space<vmem>>, vector<16x6xf32>
    %cst_64 = arith.constant dense<0.000000e+00> : vector<2x6xf32>
    %346 = tpu.matmul %344, %345, %cst_64 {dimension_numbers = #tpu.dot_dimension_numbers<[1], [0], [0], [1], [0, 0, 1, 1], [], []>} : vector<2x16xf32>, vector<16x6xf32>, vector<2x6xf32> -> vector<2x6xf32>
    %c0_65 = arith.constant 0 : index
    %c0_66 = arith.constant 0 : index
    %347 = vector.load %arg10[%c0_65, %c0_66] : memref<1x6xf32, #tpu.memory_space<vmem>>, vector<1x6xf32>
    %348 = vector.broadcast %347 : vector<1x6xf32> to vector<2x6xf32>
    %349 = arith.addf %346, %348 : vector<2x6xf32>
    %c0_67 = arith.constant 0 : index
    %c0_68 = arith.constant 0 : index
    %350 = vector.load %arg11[%c0_67, %c0_68] : memref<2x6xf32, #tpu.memory_space<vmem>>, vector<2x6xf32>
    tpu.vector_store %arg11[%c0_67, %c0_68], %349 {strides = array<i32>} : memref<2x6xf32, #tpu.memory_space<vmem>>, vector<2x6xf32>,
    return
  }
}

</mosaic_0001>

<bundles_post_ra>
// kernel: rnn_module_forward.1
= control target key start
LH: loop header
LB: loop body
LE: loop exit
PB: predicated region body
PF: predicated region fallthrough
CT: control target
= control target key end

     0   :  { %16 = vsyncpa [#allocation3], 0  ;;  %s2122_s0 = inlined_call_operand.vmem [shape: f32[16,4], index: 0, kind: input, shape index: {}]   ;;  %s2123_s1 = inlined_call_operand.vmem [shape: f32[4,128], index: 1, kind: input, shape index: {}]   ;;  %s2124_s2 = inlined_call_operand.vmem [shape: f32[32,128], index: 2, kind: input, shape index: {}]   ;;  %s2125_s3 = inlined_call_operand.vmem [shape: f32[1,128], index: 3, kind: input, shape index: {}]   ;;  %s2126_s4 = inlined_call_operand.hbm [shape: f32[32,128], index: 4, kind: input, shape index: {}]   ;;  %s2127_s5 = inlined_call_operand.hbm [shape: f32[32,128], index: 5, kind: input, shape index: {}]   ;;  %s2128_s6 = inlined_call_operand.vmem [shape: f32[1,128], index: 6, kind: input, shape index: {}]   ;;  %s2129_s7 = inlined_call_operand.vmem [shape: f32[32,16], index: 7, kind: input, shape index: {}]   ;;  %s2130_s8 = inlined_call_operand.vmem [shape: f32[1,16], index: 8, kind: input, shape index: {}]   ;;  %s2131_s9 = inlined_call_operand.vmem [shape: f32[16,6], index: 9, kind: input, shape index: {}]   ;;  %s2132_s10 = inlined_call_operand.vmem [shape: f32[1,6], index: 10, kind: input, shape index: {}]   ;;  %s2133_s11 = inlined_call_operand.vmem [shape: f32[2,6], index: 11, kind: output, shape index: {}]  }
   0x1   :  { %s30_s19 = sshll.u32 %s2126_s4, 4  ;;  %s31_s19 = int_to_ptr.hbm [resolvable:$true] %s30_s19 }
   0x2   :  { %17 = vsyncpa [#allocation5], 0  ;;  %s1666_s20 = smov [#allocation2]   ;;  %s43_s24 = sshll.u32 %s2127_s5, 4  ;;  %s44_s24 = int_to_ptr.hbm [resolvable:$true] %s43_s24 }
   0x3   :  { %s32_s21 = sshll.u32 %s1666_s20, 4  ;;  %s1667_s25 = smov 128   ;;  %s33_s21 = int_to_ptr.vmem [resolvable:$true] %s32_s21 }
   0x4   :  { %s1668_s26 = smov 8   ;;  %s1669_s27 = smov [#allocation4]  }
   0x5   :  { %38 = dma.hbm_to_vmem [thread:$0]  %s31_s19, 512, %s33_s21, [#allocation3], %s1667_s25, %s1667_s25, %s1668_s26  }
   0x6   :  { %s45_s28 = sshll.u32 %s1669_s27, 4  ;;  %s46_s28 = int_to_ptr.vmem [resolvable:$true] %s45_s28 }
   0x7   :  { %51 = dma.hbm_to_vmem [thread:$0]  %s44_s24, 512, %s46_s28, [#allocation5], %s1667_s25, %s1667_s25, %s1668_s26  }
   0x8   :  { %1662 = dma.done.wait [#allocation3], 512  }
   0x9   :  { %1663 = vsyncadd [#allocation3], 4294966784 }
   0xa   :  { %1664 = dma.done.wait [#allocation5], 512  }
   0xb   :  { %1665 = vsyncadd [#allocation5], 4294966784  ;;  %vm102_vm0 = vcmask 1043456   ;;  %vm95_vm1 = vcmask 31744   ;;  %v1742_v0 = vld [vmem:[%s2124_s2 + $0x18] sm:$0xff]  ;;  %v1747_v1 = vld [vmem:[%s2124_s2 + $0x10] sm:$0xff]  ;;  %v70_v15 = vlaneseq }
   0xc   :  { %v90_v2 = vld [vmem:[%s2123_s1] sm:$0xf]  ;;  %145 = vmatpush.msra.mxu1 %v1742_v0  ;;  %v1759_v4 = vld [vmem:[%s2124_s2 + $0x8] sm:$0xff]  ;;  %v1670_v6 = vmov 0.0   ;;  %s1672_s20 = smov 32   ;;  %v1800_v36 = vld [vmem:[#allocation4 + $0x18] sm:$0xff] }
   0xd   :  { %1431 = vmatpush.msk.msra.mxu0 %vm102_vm0, %v90_v2  ;;  %v88_v3 = vld [vmem:[%s2122_s0] sm:$0xff]  ;;  %v71_v17 = vand.u32 127, %v70_v15  ;;  %v1802_v37 = vld [vmem:[#allocation2 + $0x18] sm:$0xff]  ;;  %v1804_v38 = vld [vmem:[#allocation4 + $0x10] sm:$0xff]  ;;  %204 = vmatpush.msra.mxu2 %v1800_v36  ;;  %vm129_vm9 = vcmask 261120  }
   0xe   :  { %1432 = vmatmul.msk.f32.vlgmr.msra.gmra.mxu0 %vm95_vm1, %v88_v3  ;;  %146 = vmatpush.msra.mxu1 %v1747_v1  ;;  %v1767_v5 = vld [vmem:[%s2124_s2] sm:$0xff]  ;;  %v1808_v39 = vld [vmem:[#allocation2 + $0x10] sm:$0xff]  ;;  %v1810_v40 = vld [vmem:[#allocation4 + $0x8] sm:$0xff] }
   0xf   :  { %446 = vmatpush.msrb.mxu0 %v1742_v0  ;;  %v1782_v7 = vld [vmem:[%s2125_s3] ss:$0 sm:$0xff]  ;;  %vm72_vm2 = vcmp.ge.s32.totalorder %v71_v17, 64  ;;  %vm73_vm3 = vcmp.lt.s32.totalorder %v71_v17, 96  ;;  %s1671_s3 = smov 64   ;;  %229 = vmatpush.msra.mxu3 %v1802_v37  ;;  %v1812_v41 = vld [vmem:[#allocation2 + $0x8] sm:$0xff] }
  0x10   :  { %147 = vmatpush.msra.mxu1 %v1759_v4  ;;  %vm1788_vm5 = vmand %vm72_vm2, %vm73_vm3  ;;  %205 = vmatpush.msra.mxu2 %v1804_v38  ;;  %v1818_v42 = vld [vmem:[#allocation4] sm:$0xff]  ;;  %v1362_v23 = vld [vmem:[%s2129_s7 + $0x10] sm:$0xff] }
  0x11   :  { %447 = vmatpush.msrb.mxu0 %v1747_v1  ;;  %230 = vmatpush.msra.mxu3 %v1808_v39  ;;  %v1820_v43 = vld [vmem:[#allocation2] sm:$0xff] }
  0x12   :  { %148 = vmatpush.msra.mxu1 %v1767_v5  ;;  %206 = vmatpush.msra.mxu2 %v1810_v40  ;;  %v1860_v52 = vld [vmem:[%s2128_s6] ss:$0 sm:$0xff] }
  0x13   :  { %448 = vmatpush.msrb.mxu0 %v1759_v4  ;;  %149 = vmatmul.f32.vlgmr.msra.gmra.mxu1 %v1670_v6 }
  0x14   :  { %291 = vmatpush.msrb.mxu1 %v1742_v0  ;;  %231 = vmatpush.msra.mxu3 %v1812_v41 }
  0x15   :  { %449 = vmatpush.msrb.mxu0 %v1767_v5  ;;  %207 = vmatpush.msra.mxu2 %v1818_v42 }
  0x16   :  { %292 = vmatpush.msrb.mxu1 %v1747_v1  ;;  %232 = vmatpush.msra.mxu3 %v1820_v43 }
  0x17   :  { %671 = vmatpush.msra.mxu0 %v1800_v36  ;;  %208 = vmatmul.f32.vlgmr.msra.gmra.mxu2 %v1670_v6 }
  0x18   :  { %293 = vmatpush.msrb.mxu1 %v1759_v4  ;;  %387 = vmatpush.msrb.mxu3 %v1802_v37 }
  0x19   :  { %672 = vmatpush.msra.mxu0 %v1804_v38  ;;  %361 = vmatpush.msrb.mxu2 %v1800_v36 }
  0x1a   :  { %294 = vmatpush.msrb.mxu1 %v1767_v5  ;;  %388 = vmatpush.msrb.mxu3 %v1808_v39 }
  0x1b   :  { %673 = vmatpush.msra.mxu0 %v1810_v40  ;;  %362 = vmatpush.msrb.mxu2 %v1804_v38 }
  0x1c   :  { %516 = vmatpush.msra.mxu1 %v1800_v36  ;;  %389 = vmatpush.msrb.mxu3 %v1812_v41 }
  0x1d   :  { %674 = vmatpush.msra.mxu0 %v1818_v42  ;;  %363 = vmatpush.msrb.mxu2 %v1810_v40 }
  0x1e   :  { %517 = vmatpush.msra.mxu1 %v1804_v38  ;;  %390 = vmatpush.msrb.mxu3 %v1820_v43 }
  0x1f   :  { %364 = vmatpush.msrb.mxu2 %v1818_v42 }
  0x20   :  { %518 = vmatpush.msra.mxu1 %v1810_v40 }
  0x21   :  { %542 = vmatpush.msra.mxu2 %v1802_v37 }
  0x22   :  { %519 = vmatpush.msra.mxu1 %v1818_v42 }
  0x23   :  { %543 = vmatpush.msra.mxu2 %v1808_v39 }
  0x25   :  { %544 = vmatpush.msra.mxu2 %v1812_v41 }
  0x27   :  { %545 = vmatpush.msra.mxu2 %v1820_v43 }
  0x8b   :  { %v123_v8 = vpop.f32.mrf.mxu0 }
  0x8c   :  { %v1785_v9 = vadd.f32 %v1782_v7, %v123_v8 }
  0x90   :  { %v150_v10 = vpop.f32.mrf.mxu1 }
  0x91   :  { %v153_v11 = vadd.f32 %v150_v10, %v1785_v9 }
  0x93   :  { %v1434_v12 = vmul.f32 -1.442695, %v153_v11 }
  0x95   :  { %1485 = vpow2.f32 %v1434_v12 }
  0x9a   :  { %v209_v50 = vpop.f32.mrf.mxu2 }
  0x9b   :  { %v1486_v13 = vpop.eup %1485 }
  0x9c   :  { %v158_v14 = vadd.f32 1.0, %v1486_v13 }
  0x9e   :  { %1487 = vrcp.f32 %v158_v14  ;;  %v170_v20 = vand.u32 2147483648, %v158_v14  ;;  %v168_v22 = vand.u32 2147483647, %v158_v14  ;;  %vm164_vm6 = vweird.f32 %v158_v14 }
  0x9f   :  { %1489 = vtanh.f32 %v153_v11 }
  0xa0   :  { %v171_v25 = vor.u32 1.1754944e-38, %v170_v20  ;;  %vm169_vm8 = vcmp.eq.f32.partialorder %v168_v22, 8.507059e+37 }
  0xa4   :  { %v1488_v16 = vpop.eup %1487 }
  0xa5   :  { %v160_v18 = vmul.f32 %v1488_v16, %v158_v14  ;;  %vm165_vm4 = vweird.f32 %v1488_v16  ;;  %v1490_v27 = vpop.eup %1489 }
  0xa6   :  { %vm166_vm7 = vmor %vm164_vm6, %vm165_vm4 }
  0xa7   :  { %v161_v19 = vsub.f32 1.0, %v160_v18 }
  0xa9   :  { %v162_v21 = vmul.f32 %v1488_v16, %v161_v19 }
  0xab   :  { %v163_v24 = vadd.f32 %v1488_v16, %v162_v21 }
  0xad   :  { %v167_v26 = vsel %vm166_vm7, %v1488_v16, %v163_v24 }
  0xae   :  { %v172_v28 = vsel %vm169_vm8, %v171_v25, %v167_v26 }
  0xaf   :  { %v174_v29 = vsel %vm1788_vm5, %v1490_v27, %v172_v28 }
  0xb0   :  { %177 = vrot.lane.b32.xlu0 %v174_v29, %s1671_s3  ;;  %v175_v32 = vmul.f32 0.0, %v174_v29 }
 0x122   :  { %v178_v30 = vpop.permute.xlu0 %177 }
 0x123   :  { %v180_v31 = vmul.f32 %v178_v30, %v174_v29 }
 0x125   :  { %182 = vrot.lane.b32.xlu0 %v180_v31, %s1672_s20 }
 0x197   :  { %v183_v33 = vpop.permute.xlu0 %182 }
 0x198   :  { %v1796_v34 = vadd.f32 %v183_v33, %v175_v32 }
 0x19a   :  { %1491 = vtanh.f32 %v1796_v34  ;;  %v325_v32 = vrot.slane %v1796_v34, 6 }
 0x1a0   :  { %v1492_v35 = vpop.eup %1491 }
 0x1a1   :  { %188 = vrot.lane.b32.xlu1 %v1492_v35, %s1671_s3 }
 0x213   :  { %v189_v44 = vpop.permute.xlu1 %188 }
 0x214   :  { %v191_v45 = vmul.f32 %v189_v44, %v174_v29 }
 0x216   :  { %213 = vrot.lane.b32.xlu1 %v191_v45, %s1672_s20 }
 0x288   :  { %v214_v46 = vpop.permute.xlu1 %213 }
 0x289   :  { %1435 = vmatmul.msk.f32.vlgmr.msra.gmra.mxu3 %vm129_vm9, %v214_v46  ;;  %1437 = vmatmul.msk.f32.vlgmr.msrb.gmra.mxu1 %vm129_vm9, %v214_v46 }
 0x28a   :  { %601 = vmatpush.msra.mxu3 %v1742_v0  ;;  %697 = vmatpush.msrb.mxu1 %v1802_v37 }
 0x28c   :  { %602 = vmatpush.msra.mxu3 %v1747_v1  ;;  %698 = vmatpush.msrb.mxu1 %v1808_v39 }
 0x28e   :  { %603 = vmatpush.msra.mxu3 %v1759_v4  ;;  %699 = vmatpush.msrb.mxu1 %v1812_v41 }
 0x290   :  { %604 = vmatpush.msra.mxu3 %v1767_v5  ;;  %700 = vmatpush.msrb.mxu1 %v1820_v43 }
 0x306   :  { %v296_v47 = vpop.f32.mrf.mxu1 }
 0x307   :  { %v300_v48 = vrot.slane %v296_v47, 6 }
 0x309   :  { %v302_v49 = vadd.f32 %v300_v48, %v1785_v9 }
 0x30b   :  { %v1438_v51 = vmul.f32 -1.442695, %v302_v49 }
 0x30c   :  { %v234_v53 = vpop.f32.mrf.mxu3 }
 0x30d   :  { %1493 = vpow2.f32 %v1438_v51  ;;  %v235_v54 = vadd.f32 %v234_v53, %v209_v50  ;;  %v89_v53 = vld [vmem:[%s2122_s0 + $0x8] sm:$0xff] }
 0x30e   :  { %1433 = vmatmul.msk.f32.gmra.mxu0 %vm95_vm1, %v89_v53 }
 0x30f   :  { %v240_v55 = vadd.f32 %v1860_v52, %v235_v54 }
 0x311   :  { %v1436_v56 = vmul.f32 -1.442695, %v240_v55 }
 0x313   :  { %v1494_v57 = vpop.eup %1493  ;;  %1495 = vpow2.f32 %v1436_v56 }
 0x314   :  { %v307_v58 = vadd.f32 1.0, %v1494_v57 }
 0x316   :  { %1497 = vrcp.f32 %v307_v58  ;;  %v319_v2 = vand.u32 2147483648, %v307_v58  ;;  %v317_v6 = vand.u32 2147483647, %v307_v58  ;;  %vm313_vm11 = vweird.f32 %v307_v58 }
 0x318   :  { %v320_v12 = vor.u32 1.1754944e-38, %v319_v2  ;;  %vm318_vm13 = vcmp.eq.f32.partialorder %v317_v6, 8.507059e+37 }
 0x319   :  { %v1496_v59 = vpop.eup %1495 }
 0x31a   :  { %v245_v60 = vadd.f32 1.0, %v1496_v59 }
 0x31c   :  { %v1498_v61 = vpop.eup %1497  ;;  %1499 = vrcp.f32 %v245_v60  ;;  %v257_v17 = vand.u32 2147483648, %v245_v60  ;;  %v255_v20 = vand.u32 2147483647, %v245_v60  ;;  %vm251_vm15 = vweird.f32 %v245_v60 }
 0x31d   :  { %v309_v62 = vmul.f32 %v1498_v61, %v307_v58  ;;  %1501 = vtanh.f32 %v302_v49  ;;  %vm314_vm10 = vweird.f32 %v1498_v61 }
 0x31e   :  { %vm315_vm12 = vmor %vm313_vm11, %vm314_vm10  ;;  %1503 = vtanh.f32 %v240_v55  ;;  %v258_v22 = vor.u32 1.1754944e-38, %v257_v17  ;;  %vm256_vm2 = vcmp.eq.f32.partialorder %v255_v20, 8.507059e+37 }
 0x31f   :  { %v310_v63 = vsub.f32 1.0, %v309_v62 }
 0x321   :  { %v311_v3 = vmul.f32 %v1498_v61, %v310_v63 }
 0x322   :  { %v1500_v8 = vpop.eup %1499 }
 0x323   :  { %v312_v10 = vadd.f32 %v1498_v61, %v311_v3  ;;  %v247_v11 = vmul.f32 %v1500_v8, %v245_v60  ;;  %v1502_v15 = vpop.eup %1501  ;;  %vm252_vm14 = vweird.f32 %v1500_v8 }
 0x324   :  { %vm253_vm0 = vmor %vm251_vm15, %vm252_vm14  ;;  %v1504_v26 = vpop.eup %1503 }
 0x325   :  { %v316_v13 = vsel %vm315_vm12, %v1498_v61, %v312_v10  ;;  %v248_v14 = vsub.f32 1.0, %v247_v11 }
 0x326   :  { %v321_v16 = vsel %vm318_vm13, %v320_v12, %v316_v13 }
 0x327   :  { %v323_v18 = vsel %vm1788_vm5, %v1502_v15, %v321_v16  ;;  %v249_v19 = vmul.f32 %v1500_v8, %v248_v14 }
 0x328   :  { %329 = vrot.lane.b32.xlu2 %v323_v18, %s1671_s3  ;;  %v327_v33 = vmul.f32 %v325_v32, %v323_v18 }
 0x329   :  { %v250_v21 = vadd.f32 %v1500_v8, %v249_v19 }
 0x32b   :  { %v254_v24 = vsel %vm253_vm0, %v1500_v8, %v250_v21 }
 0x32c   :  { %v259_v25 = vsel %vm256_vm2, %v258_v22, %v254_v24 }
 0x32d   :  { %v261_v27 = vsel %vm1788_vm5, %v1504_v26, %v259_v25 }
 0x32e   :  { %v262_v45 = vmul.f32 0.0, %v261_v27 }
 0x330   :  { %264 = vrot.lane.b32.xlu2 %v261_v27, %s1671_s3 }
 0x382   :  { %v330_v28 = vpop.permute.xlu2 %329 }
 0x383   :  { %v332_v29 = vmul.f32 %v330_v28, %v323_v18 }
 0x385   :  { %334 = vrot.lane.b32.xlu0 %v332_v29, %s1672_s20 }
 0x38a   :  { %v265_v30 = vpop.permute.xlu2 %264 }
 0x38b   :  { %v267_v31 = vmul.f32 %v265_v30, %v261_v27  ;;  %v1901_v58 = vpop.f32.mrf.mxu0 }
 0x38d   :  { %269 = vrot.lane.b32.xlu1 %v267_v31, %s1672_s20 }
 0x3f7   :  { %v335_v35 = vpop.permute.xlu0 %334 }
 0x3f8   :  { %v1872_v44 = vadd.f32 %v335_v35, %v327_v33 }
 0x3fa   :  { %1505 = vtanh.f32 %v1872_v44 }
 0x3ff   :  { %v270_v46 = vpop.permute.xlu1 %269 }
 0x400   :  { %v1506_v47 = vpop.eup %1505  ;;  %v1875_v48 = vadd.f32 %v270_v46, %v262_v45 }
 0x401   :  { %340 = vrot.lane.b32.xlu2 %v1506_v47, %s1671_s3 }
 0x402   :  { %1507 = vtanh.f32 %v1875_v48 }
 0x408   :  { %v1508_v49 = vpop.eup %1507 }
 0x409   :  { %275 = vrot.lane.b32.xlu0 %v1508_v49, %s1671_s3 }
 0x45b   :  { %v341_v50 = vpop.permute.xlu2 %340 }
 0x45c   :  { %v343_v34 = vmul.f32 %v341_v50, %v323_v18 }
 0x45e   :  { %v370_v51 = vrot.slane %v343_v34, 2 }
 0x460   :  { %371 = vrot.lane.b32.xlu1 %v370_v51, %s1672_s20 }
 0x47b   :  { %v276_v54 = vpop.permute.xlu0 %275 }
 0x47c   :  { %v278_v55 = vmul.f32 %v276_v54, %v261_v27  ;;  %v480_v54 = vrot.slane %v1872_v44, 6 }
 0x47e   :  { %345 = vrot.lane.b32.xlu2 %v278_v55, %s1672_s20 }
 0x4d2   :  { %v372_v56 = vpop.permute.xlu1 %371 }
 0x4d3   :  { %1440 = vmatmul.msk.f32.vlgmr.msrb.gmra.mxu3 %vm129_vm9, %v372_v56  ;;  %1442 = vmatmul.msk.f32.vlgmr.msrb.gmra.mxu0 %vm129_vm9, %v372_v56 }
 0x4d4   :  { %848 = vmatpush.msrb.mxu0 %v1802_v37  ;;  %823 = vmatpush.msrb.mxu3 %v1800_v36 }
 0x4d6   :  { %849 = vmatpush.msrb.mxu0 %v1808_v39  ;;  %824 = vmatpush.msrb.mxu3 %v1804_v38 }
 0x4d8   :  { %v346_v57 = vpop.permute.xlu2 %345  ;;  %850 = vmatpush.msrb.mxu0 %v1812_v41  ;;  %825 = vmatpush.msrb.mxu3 %v1810_v40 }
 0x4d9   :  { %1439 = vmatmul.msk.f32.vlgmr.msrb.gmra.mxu2 %vm129_vm9, %v346_v57 }
 0x4da   :  { %756 = vmatpush.msrb.mxu2 %v1742_v0  ;;  %851 = vmatpush.msrb.mxu0 %v1820_v43 }
 0x4db   :  { %826 = vmatpush.msrb.mxu3 %v1818_v42 }
 0x4dc   :  { %757 = vmatpush.msrb.mxu2 %v1747_v1 }
 0x4de   :  { %758 = vmatpush.msrb.mxu2 %v1759_v4 }
 0x4e0   :  { %759 = vmatpush.msrb.mxu2 %v1767_v5 }
 0x550   :  { %v451_v59 = vpop.f32.mrf.mxu0 }
 0x551   :  { %v455_v60 = vrot.slane %v451_v59, 4 }
 0x553   :  { %v457_v61 = vadd.f32 %v455_v60, %v1785_v9 }
 0x555   :  { %v1443_v62 = vmul.f32 -1.442695, %v457_v61 }
 0x556   :  { %v392_v63 = vpop.f32.mrf.mxu3 }
 0x557   :  { %1509 = vpow2.f32 %v1443_v62 }
 0x55c   :  { %v366_v2 = vpop.f32.mrf.mxu2 }
 0x55d   :  { %v1510_v3 = vpop.eup %1509  ;;  %v393_v6 = vadd.f32 %v392_v63, %v366_v2 }
 0x55e   :  { %v462_v8 = vadd.f32 1.0, %v1510_v3 }
 0x55f   :  { %v395_v10 = vadd.f32 %v1860_v52, %v393_v6 }
 0x560   :  { %1511 = vrcp.f32 %v462_v8  ;;  %v474_v17 = vand.u32 2147483648, %v462_v8  ;;  %v472_v19 = vand.u32 2147483647, %v462_v8  ;;  %vm468_vm3 = vweird.f32 %v462_v8 }
 0x561   :  { %v1441_v11 = vmul.f32 -1.442695, %v395_v10 }
 0x562   :  { %v475_v21 = vor.u32 1.1754944e-38, %v474_v17  ;;  %vm473_vm6 = vcmp.eq.f32.partialorder %v472_v19, 8.507059e+37 }
 0x563   :  { %1513 = vpow2.f32 %v1441_v11 }
 0x564   :  { %1515 = vtanh.f32 %v457_v61 }
 0x566   :  { %v1512_v12 = vpop.eup %1511 }
 0x567   :  { %v464_v13 = vmul.f32 %v1512_v12, %v462_v8  ;;  %vm469_vm1 = vweird.f32 %v1512_v12 }
 0x568   :  { %vm470_vm4 = vmor %vm468_vm3, %vm469_vm1 }
 0x569   :  { %v1514_v14 = vpop.eup %1513  ;;  %v465_v15 = vsub.f32 1.0, %v464_v13 }
 0x56a   :  { %v400_v16 = vadd.f32 1.0, %v1514_v14  ;;  %v1516_v24 = vpop.eup %1515 }
 0x56b   :  { %v466_v18 = vmul.f32 %v1512_v12, %v465_v15 }
 0x56c   :  { %1517 = vrcp.f32 %v400_v16  ;;  %v412_v30 = vand.u32 2147483648, %v400_v16  ;;  %v410_v32 = vand.u32 2147483647, %v400_v16  ;;  %vm406_vm8 = vweird.f32 %v400_v16 }
 0x56d   :  { %v467_v20 = vadd.f32 %v1512_v12, %v466_v18  ;;  %1519 = vtanh.f32 %v395_v10 }
 0x56e   :  { %v413_v35 = vor.u32 1.1754944e-38, %v412_v30  ;;  %vm411_vm11 = vcmp.eq.f32.partialorder %v410_v32, 8.507059e+37 }
 0x56f   :  { %v471_v22 = vsel %vm470_vm4, %v1512_v12, %v467_v20 }
 0x570   :  { %v476_v25 = vsel %vm473_vm6, %v475_v21, %v471_v22 }
 0x571   :  { %v478_v26 = vsel %vm1788_vm5, %v1516_v24, %v476_v25 }
 0x572   :  { %v1518_v27 = vpop.eup %1517  ;;  %484 = vrot.lane.b32.xlu0 %v478_v26, %s1671_s3  ;;  %v482_v55 = vmul.f32 %v480_v54, %v478_v26 }
 0x573   :  { %v402_v28 = vmul.f32 %v1518_v27, %v400_v16  ;;  %vm407_vm7 = vweird.f32 %v1518_v27  ;;  %v1520_v46 = vpop.eup %1519 }
 0x574   :  { %vm408_vm10 = vmor %vm406_vm8, %vm407_vm7 }
 0x575   :  { %v403_v29 = vsub.f32 1.0, %v402_v28 }
 0x577   :  { %v404_v31 = vmul.f32 %v1518_v27, %v403_v29 }
 0x579   :  { %v405_v33 = vadd.f32 %v1518_v27, %v404_v31 }
 0x57b   :  { %v409_v45 = vsel %vm408_vm10, %v1518_v27, %v405_v33 }
 0x57c   :  { %v414_v47 = vsel %vm411_vm11, %v413_v35, %v409_v45 }
 0x57d   :  { %v416_v49 = vsel %vm1788_vm5, %v1520_v46, %v414_v47 }
 0x57e   :  { %419 = vrot.lane.b32.xlu1 %v416_v49, %s1671_s3  ;;  %v417_v60 = vmul.f32 %v416_v49, %v1875_v48 }
 0x5e4   :  { %v485_v50 = vpop.permute.xlu0 %484 }
 0x5e5   :  { %v487_v34 = vmul.f32 %v485_v50, %v478_v26 }
 0x5e7   :  { %489 = vrot.lane.b32.xlu2 %v487_v34, %s1672_s20 }
 0x5f0   :  { %v420_v51 = vpop.permute.xlu1 %419 }
 0x5f1   :  { %v422_v53 = vmul.f32 %v420_v51, %v416_v49 }
 0x5f3   :  { %424 = vrot.lane.b32.xlu0 %v422_v53, %s1672_s20 }
 0x641   :  { %v490_v56 = vpop.permute.xlu2 %489 }
 0x642   :  { %v1914_v57 = vadd.f32 %v490_v56, %v482_v55 }
 0x644   :  { %1521 = vtanh.f32 %v1914_v57 }
 0x64a   :  { %v1522_v59 = vpop.eup %1521 }
 0x64b   :  { %495 = vrot.lane.b32.xlu1 %v1522_v59, %s1671_s3 }
 0x665   :  { %v425_v61 = vpop.permute.xlu0 %424 }
 0x666   :  { %v1919_v62 = vadd.f32 %v425_v61, %v417_v60 }
 0x668   :  { %1523 = vtanh.f32 %v1919_v62 }
 0x66e   :  { %v1524_v63 = vpop.eup %1523 }
 0x66f   :  { %430 = vrot.lane.b32.xlu2 %v1524_v63, %s1671_s3 }
 0x6bd   :  { %v496_v44 = vpop.permute.xlu1 %495 }
 0x6be   :  { %v498_v2 = vmul.f32 %v496_v44, %v478_v26 }
 0x6c0   :  { %v525_v3 = vrot.slane %v498_v2, 4 }
 0x6c2   :  { %526 = vrot.lane.b32.xlu0 %v525_v3, %s1672_s20  ;;  %v635_v3 = vrot.slane %v1914_v57, 6 }
 0x6c9   :  { %v431_v6 = vpop.permute.xlu2 %430 }
 0x6ca   :  { %v433_v8 = vmul.f32 %v431_v6, %v416_v49 }
 0x6cc   :  { %500 = vrot.lane.b32.xlu1 %v433_v8, %s1672_s20 }
 0x734   :  { %v527_v10 = vpop.permute.xlu0 %526 }
 0x735   :  { %1445 = vmatmul.msk.f32.vlgmr.msra.gmra.mxu2 %vm129_vm9, %v527_v10  ;;  %1447 = vmatmul.msk.f32.vlgmr.msra.gmra.mxu3 %vm129_vm9, %v527_v10 }
 0x736   :  { %1003 = vmatpush.msra.mxu3 %v1802_v37  ;;  %977 = vmatpush.msra.mxu2 %v1800_v36 }
 0x738   :  { %1004 = vmatpush.msra.mxu3 %v1808_v39  ;;  %978 = vmatpush.msra.mxu2 %v1804_v38 }
 0x73a   :  { %1005 = vmatpush.msra.mxu3 %v1812_v41  ;;  %979 = vmatpush.msra.mxu2 %v1810_v40 }
 0x73c   :  { %1006 = vmatpush.msra.mxu3 %v1820_v43  ;;  %980 = vmatpush.msra.mxu2 %v1818_v42 }
 0x73e   :  { %v501_v48 = vpop.permute.xlu1 %500 }
 0x73f   :  { %1444 = vmatmul.msk.f32.vlgmr.msra.gmra.mxu1 %vm129_vm9, %v501_v48 }
 0x740   :  { %907 = vmatpush.msra.mxu1 %v1742_v0 }
 0x742   :  { %908 = vmatpush.msra.mxu1 %v1747_v1 }
 0x744   :  { %909 = vmatpush.msra.mxu1 %v1759_v4 }
 0x746   :  { %910 = vmatpush.msra.mxu1 %v1767_v5 }
 0x7b8   :  { %v606_v11 = vpop.f32.mrf.mxu3  ;;  %v547_v14 = vpop.f32.mrf.mxu2 }
 0x7b9   :  { %v610_v12 = vrot.slane %v606_v11, 2 }
 0x7bb   :  { %v612_v13 = vadd.f32 %v610_v12, %v1785_v9 }
 0x7bc   :  { %v521_v15 = vpop.f32.mrf.mxu1 }
 0x7bd   :  { %v1448_v16 = vmul.f32 -1.442695, %v612_v13  ;;  %v548_v17 = vadd.f32 %v547_v14, %v521_v15 }
 0x7bf   :  { %1525 = vpow2.f32 %v1448_v16  ;;  %v550_v18 = vadd.f32 %v1860_v52, %v548_v17 }
 0x7c1   :  { %v1446_v19 = vmul.f32 -1.442695, %v550_v18 }
 0x7c3   :  { %1527 = vpow2.f32 %v1446_v19 }
 0x7c5   :  { %v1526_v20 = vpop.eup %1525 }
 0x7c6   :  { %v617_v21 = vadd.f32 1.0, %v1526_v20  ;;  %v1979_v20 = vadd.f32 %v1782_v7, %v1901_v58 }
 0x7c8   :  { %1529 = vrcp.f32 %v617_v21  ;;  %v627_v9 = vand.u32 2147483647, %v617_v21  ;;  %v629_v29 = vand.u32 2147483648, %v617_v21  ;;  %vm623_vm13 = vweird.f32 %v617_v21 }
 0x7c9   :  { %v1528_v22 = vpop.eup %1527 }
 0x7ca   :  { %v555_v24 = vadd.f32 1.0, %v1528_v22  ;;  %vm628_vm15 = vcmp.eq.f32.partialorder %v627_v9, 8.507059e+37  ;;  %v630_v35 = vor.u32 1.1754944e-38, %v629_v29 }
 0x7cc   :  { %1531 = vrcp.f32 %v555_v24  ;;  %v567_v45 = vand.u32 2147483648, %v555_v24  ;;  %v565_v49 = vand.u32 2147483647, %v555_v24  ;;  %vm561_vm2 = vweird.f32 %v555_v24 }
 0x7cd   :  { %1533 = vtanh.f32 %v612_v13 }
 0x7ce   :  { %v1530_v25 = vpop.eup %1529  ;;  %1535 = vtanh.f32 %v550_v18  ;;  %v568_v54 = vor.u32 1.1754944e-38, %v567_v45  ;;  %vm566_vm3 = vcmp.eq.f32.partialorder %v565_v49, 8.507059e+37 }
 0x7cf   :  { %v619_v26 = vmul.f32 %v1530_v25, %v617_v21  ;;  %vm624_vm12 = vweird.f32 %v1530_v25 }
 0x7d0   :  { %vm625_vm14 = vmor %vm623_vm13, %vm624_vm12 }
 0x7d1   :  { %v620_v27 = vsub.f32 1.0, %v619_v26 }
 0x7d2   :  { %v1532_v28 = vpop.eup %1531 }
 0x7d3   :  { %v621_v30 = vmul.f32 %v1530_v25, %v620_v27  ;;  %v557_v31 = vmul.f32 %v1532_v28, %v555_v24  ;;  %vm562_vm0 = vweird.f32 %v1532_v28  ;;  %v1534_v50 = vpop.eup %1533 }
 0x7d4   :  { %vm563_vm1 = vmor %vm561_vm2, %vm562_vm0  ;;  %v1536_v56 = vpop.eup %1535 }
 0x7d5   :  { %v622_v32 = vadd.f32 %v1530_v25, %v621_v30  ;;  %v558_v33 = vsub.f32 1.0, %v557_v31 }
 0x7d7   :  { %v626_v46 = vsel %vm625_vm14, %v1530_v25, %v622_v32  ;;  %v559_v47 = vmul.f32 %v1532_v28, %v558_v33 }
 0x7d8   :  { %v631_v34 = vsel %vm628_vm15, %v630_v35, %v626_v46 }
 0x7d9   :  { %v633_v51 = vsel %vm1788_vm5, %v1534_v50, %v631_v34  ;;  %v560_v53 = vadd.f32 %v1532_v28, %v559_v47 }
 0x7da   :  { %639 = vrot.lane.b32.xlu2 %v633_v51, %s1671_s3  ;;  %v637_v6 = vmul.f32 %v635_v3, %v633_v51 }
 0x7db   :  { %v564_v55 = vsel %vm563_vm1, %v1532_v28, %v560_v53 }
 0x7dc   :  { %v569_v59 = vsel %vm566_vm3, %v568_v54, %v564_v55 }
 0x7dd   :  { %v571_v60 = vsel %vm1788_vm5, %v1536_v56, %v569_v59 }
 0x7de   :  { %574 = vrot.lane.b32.xlu0 %v571_v60, %s1671_s3  ;;  %v572_v48 = vmul.f32 %v571_v60, %v1919_v62 }
 0x834   :  { %v640_v61 = vpop.permute.xlu2 %639 }
 0x835   :  { %v642_v63 = vmul.f32 %v640_v61, %v633_v51 }
 0x837   :  { %644 = vrot.lane.b32.xlu1 %v642_v63, %s1672_s20 }
 0x850   :  { %v575_v44 = vpop.permute.xlu0 %574 }
 0x851   :  { %v577_v2 = vmul.f32 %v575_v44, %v571_v60 }
 0x853   :  { %579 = vrot.lane.b32.xlu2 %v577_v2, %s1672_s20 }
 0x8a9   :  { %v645_v8 = vpop.permute.xlu1 %644 }
 0x8aa   :  { %v1951_v10 = vadd.f32 %v645_v8, %v637_v6 }
 0x8ac   :  { %1537 = vtanh.f32 %v1951_v10 }
 0x8ad   :  { %v580_v11 = vpop.permute.xlu2 %579 }
 0x8ae   :  { %v1955_v12 = vadd.f32 %v580_v11, %v572_v48 }
 0x8b0   :  { %1539 = vtanh.f32 %v1955_v12 }
 0x8b2   :  { %v1538_v13 = vpop.eup %1537 }
 0x8b3   :  { %650 = vrot.lane.b32.xlu0 %v1538_v13, %s1671_s3 }
 0x8b6   :  { %v1540_v14 = vpop.eup %1539 }
 0x8b7   :  { %585 = vrot.lane.b32.xlu1 %v1540_v14, %s1671_s3 }
 0x925   :  { %v651_v57 = vpop.permute.xlu0 %650 }
 0x926   :  { %v653_v15 = vmul.f32 %v651_v57, %v633_v51  ;;  %v787_v57 = vrot.slane %v1951_v10, 6 }
 0x928   :  { %v680_v16 = vrot.slane %v653_v15, 6 }
 0x929   :  { %v586_v17 = vpop.permute.xlu1 %585 }
 0x92a   :  { %v588_v18 = vmul.f32 %v586_v17, %v571_v60  ;;  %681 = vrot.lane.b32.xlu2 %v680_v16, %s1672_s20 }
 0x92c   :  { %655 = vrot.lane.b32.xlu0 %v588_v18, %s1672_s20 }
 0x984   :  { %v682_v62 = vpop.permute.xlu2 %681 }
 0x985   :  { %1450 = vmatmul.msk.f32.vlgmr.msrb.gmra.mxu1 %vm129_vm9, %v682_v62  ;;  %1452 = vmatmul.msk.f32.vlgmr.msrb.gmra.mxu2 %vm129_vm9, %v682_v62 }
 0x986   :  { %1158 = vmatpush.msrb.mxu2 %v1802_v37  ;;  %1132 = vmatpush.msrb.mxu1 %v1800_v36 }
 0x988   :  { %1159 = vmatpush.msrb.mxu2 %v1808_v39  ;;  %1133 = vmatpush.msrb.mxu1 %v1804_v38 }
 0x98a   :  { %1160 = vmatpush.msrb.mxu2 %v1812_v41  ;;  %1134 = vmatpush.msrb.mxu1 %v1810_v40 }
 0x98c   :  { %1161 = vmatpush.msrb.mxu2 %v1820_v43  ;;  %1135 = vmatpush.msrb.mxu1 %v1818_v42 }
 0x99e   :  { %v656_v19 = vpop.permute.xlu0 %655 }
 0x99f   :  { %1449 = vmatmul.msk.f32.vlgmr.msra.gmra.mxu0 %vm129_vm9, %v656_v19 }
 0x9a0   :  { %1062 = vmatpush.msra.mxu0 %v1742_v0 }
 0x9a2   :  { %1063 = vmatpush.msra.mxu0 %v1747_v1 }
 0x9a4   :  { %1064 = vmatpush.msra.mxu0 %v1759_v4 }
 0x9a6   :  { %1065 = vmatpush.msra.mxu0 %v1767_v5 }
 0xa02   :  { %v702_v28 = vpop.f32.mrf.mxu1 }
 0xa08   :  { %v761_v21 = vpop.f32.mrf.mxu2 }
 0xa09   :  { %v764_v22 = vadd.f32 %v761_v21, %v1979_v20 }
 0xa0b   :  { %v1453_v24 = vmul.f32 -1.442695, %v764_v22 }
 0xa0d   :  { %1541 = vpow2.f32 %v1453_v24 }
 0xa13   :  { %v1542_v25 = vpop.eup %1541 }
 0xa14   :  { %v769_v26 = vadd.f32 1.0, %v1542_v25 }
 0xa16   :  { %1543 = vrcp.f32 %v769_v26  ;;  %v781_v33 = vand.u32 2147483648, %v769_v26  ;;  %v779_v35 = vand.u32 2147483647, %v769_v26  ;;  %vm775_vm6 = vweird.f32 %v769_v26 }
 0xa17   :  { %1545 = vtanh.f32 %v764_v22 }
 0xa18   :  { %v782_v46 = vor.u32 1.1754944e-38, %v781_v33  ;;  %vm780_vm8 = vcmp.eq.f32.partialorder %v779_v35, 8.507059e+37 }
 0xa1c   :  { %v1544_v27 = vpop.eup %1543  ;;  %v676_v9 = vpop.f32.mrf.mxu0 }
 0xa1d   :  { %v703_v29 = vadd.f32 %v702_v28, %v676_v9  ;;  %v771_v30 = vmul.f32 %v1544_v27, %v769_v26  ;;  %vm776_vm4 = vweird.f32 %v1544_v27  ;;  %v1546_v49 = vpop.eup %1545 }
 0xa1e   :  { %vm777_vm7 = vmor %vm775_vm6, %vm776_vm4 }
 0xa1f   :  { %v705_v31 = vadd.f32 %v1860_v52, %v703_v29  ;;  %v772_v32 = vsub.f32 1.0, %v771_v30 }
 0xa21   :  { %v1451_v7 = vmul.f32 -1.442695, %v705_v31  ;;  %v773_v58 = vmul.f32 %v1544_v27, %v772_v32 }
 0xa23   :  { %1547 = vpow2.f32 %v1451_v7  ;;  %v774_v45 = vadd.f32 %v1544_v27, %v773_v58 }
 0xa25   :  { %v778_v47 = vsel %vm777_vm7, %v1544_v27, %v774_v45 }
 0xa26   :  { %v783_v50 = vsel %vm780_vm8, %v782_v46, %v778_v47 }
 0xa27   :  { %v785_v34 = vsel %vm1788_vm5, %v1546_v49, %v783_v50 }
 0xa28   :  { %791 = vrot.lane.b32.xlu2 %v785_v34, %s1671_s3  ;;  %v789_v15 = vmul.f32 %v787_v57, %v785_v34 }
 0xa29   :  { %v1548_v51 = vpop.eup %1547 }
 0xa2a   :  { %v710_v53 = vadd.f32 1.0, %v1548_v51 }
 0xa2c   :  { %1549 = vrcp.f32 %v710_v53  ;;  %v722_v59 = vand.u32 2147483648, %v710_v53  ;;  %v720_v61 = vand.u32 2147483647, %v710_v53  ;;  %vm716_vm11 = vweird.f32 %v710_v53 }
 0xa2d   :  { %1551 = vtanh.f32 %v705_v31 }
 0xa2e   :  { %v723_v44 = vor.u32 1.1754944e-38, %v722_v59  ;;  %vm721_vm13 = vcmp.eq.f32.partialorder %v720_v61, 8.507059e+37 }
 0xa32   :  { %v1550_v54 = vpop.eup %1549 }
 0xa33   :  { %v712_v55 = vmul.f32 %v1550_v54, %v710_v53  ;;  %vm717_vm10 = vweird.f32 %v1550_v54  ;;  %v1552_v3 = vpop.eup %1551 }
 0xa34   :  { %vm718_vm12 = vmor %vm716_vm11, %vm717_vm10 }
 0xa35   :  { %v713_v56 = vsub.f32 1.0, %v712_v55 }
 0xa37   :  { %v714_v60 = vmul.f32 %v1550_v54, %v713_v56 }
 0xa39   :  { %v715_v63 = vadd.f32 %v1550_v54, %v714_v60 }
 0xa3b   :  { %v719_v2 = vsel %vm718_vm12, %v1550_v54, %v715_v63 }
 0xa3c   :  { %v724_v6 = vsel %vm721_vm13, %v723_v44, %v719_v2 }
 0xa3d   :  { %v726_v8 = vsel %vm1788_vm5, %v1552_v3, %v724_v6 }
 0xa3e   :  { %729 = vrot.lane.b32.xlu1 %v726_v8, %s1671_s3  ;;  %v727_v62 = vmul.f32 %v726_v8, %v1955_v12 }
 0xa82   :  { %v792_v48 = vpop.permute.xlu2 %791 }
 0xa83   :  { %v794_v11 = vmul.f32 %v792_v48, %v785_v34 }
 0xa85   :  { %796 = vrot.lane.b32.xlu1 %v794_v11, %s1672_s20 }
 0xab0   :  { %v730_v13 = vpop.permute.xlu1 %729 }
 0xab1   :  { %v732_v14 = vmul.f32 %v730_v13, %v726_v8 }
 0xab3   :  { %734 = vrot.lane.b32.xlu0 %v732_v14, %s1672_s20 }
 0xaf7   :  { %v797_v16 = vpop.permute.xlu1 %796 }
 0xaf8   :  { %v1992_v17 = vadd.f32 %v797_v16, %v789_v15 }
 0xafa   :  { %1553 = vtanh.f32 %v1992_v17 }
 0xb00   :  { %v1554_v18 = vpop.eup %1553 }
 0xb01   :  { %802 = vrot.lane.b32.xlu0 %v1554_v18, %s1671_s3 }
 0xb25   :  { %v735_v19 = vpop.permute.xlu0 %734 }
 0xb26   :  { %v1997_v21 = vadd.f32 %v735_v19, %v727_v62 }
 0xb28   :  { %1555 = vtanh.f32 %v1997_v21 }
 0xb2e   :  { %v1556_v22 = vpop.eup %1555 }
 0xb2f   :  { %740 = vrot.lane.b32.xlu2 %v1556_v22, %s1671_s3 }
 0xb73   :  { %v803_v10 = vpop.permute.xlu0 %802 }
 0xb74   :  { %v805_v24 = vmul.f32 %v803_v10, %v785_v34 }
 0xb76   :  { %832 = vrot.lane.b32.xlu2 %v805_v24, %s1672_s20 }
 0xb89   :  { %v741_v25 = vpop.permute.xlu2 %740 }
 0xb8a   :  { %v743_v26 = vmul.f32 %v741_v25, %v726_v8  ;;  %v941_v8 = vrot.slane %v1992_v17, 6 }
 0xb8c   :  { %807 = vrot.lane.b32.xlu1 %v743_v26, %s1672_s20 }
 0xbd0   :  { %v833_v27 = vpop.permute.xlu2 %832 }
 0xbd1   :  { %1455 = vmatmul.msk.f32.vlgmr.msrb.gmra.mxu0 %vm129_vm9, %v833_v27  ;;  %1457 = vmatmul.msk.f32.vlgmr.msra.gmra.mxu1 %vm129_vm9, %v833_v27 }
 0xbd2   :  { %1313 = vmatpush.msra.mxu1 %v1802_v37  ;;  %1287 = vmatpush.msrb.mxu0 %v1800_v36 }
 0xbd4   :  { %1314 = vmatpush.msra.mxu1 %v1808_v39  ;;  %1288 = vmatpush.msrb.mxu0 %v1804_v38 }
 0xbd6   :  { %1315 = vmatpush.msra.mxu1 %v1812_v41  ;;  %1289 = vmatpush.msrb.mxu0 %v1810_v40 }
 0xbd8   :  { %1316 = vmatpush.msra.mxu1 %v1820_v43  ;;  %1290 = vmatpush.msrb.mxu0 %v1818_v42 }
 0xbfe   :  { %v808_v12 = vpop.permute.xlu1 %807 }
 0xbff   :  { %1454 = vmatmul.msk.f32.vlgmr.msrb.gmra.mxu3 %vm129_vm9, %v808_v12 }
 0xc00   :  { %1217 = vmatpush.msrb.mxu3 %v1742_v0 }
 0xc02   :  { %1218 = vmatpush.msrb.mxu3 %v1747_v1 }
 0xc04   :  { %1219 = vmatpush.msrb.mxu3 %v1759_v4 }
 0xc06   :  { %1220 = vmatpush.msrb.mxu3 %v1767_v5 }
 0xc4e   :  { %v912_v36 = vpop.f32.mrf.mxu1  ;;  %v853_v33 = vpop.f32.mrf.mxu0 }
 0xc4f   :  { %v916_v37 = vrot.slane %v912_v36, 6 }
 0xc51   :  { %v918_v38 = vadd.f32 %v916_v37, %v1979_v20 }
 0xc53   :  { %v1458_v39 = vmul.f32 -1.442695, %v918_v38 }
 0xc55   :  { %1557 = vpow2.f32 %v1458_v39 }
 0xc5b   :  { %v1558_v40 = vpop.eup %1557 }
 0xc5c   :  { %v923_v41 = vadd.f32 1.0, %v1558_v40 }
 0xc5e   :  { %1559 = vrcp.f32 %v923_v41  ;;  %v935_v0 = vand.u32 2147483648, %v923_v41  ;;  %v933_v1 = vand.u32 2147483647, %v923_v41  ;;  %vm929_vm15 = vweird.f32 %v923_v41 }
 0xc5f   :  { %1561 = vtanh.f32 %v918_v38 }
 0xc60   :  { %v936_v5 = vor.u32 1.1754944e-38, %v935_v0  ;;  %vm934_vm2 = vcmp.eq.f32.partialorder %v933_v1, 8.507059e+37 }
 0xc64   :  { %v1560_v42 = vpop.eup %1559 }
 0xc65   :  { %v925_v43 = vmul.f32 %v1560_v42, %v923_v41  ;;  %vm930_vm14 = vweird.f32 %v1560_v42  ;;  %v1562_v30 = vpop.eup %1561 }
 0xc66   :  { %vm931_vm0 = vmor %vm929_vm15, %vm930_vm14 }
 0xc67   :  { %v926_v28 = vsub.f32 1.0, %v925_v43 }
 0xc69   :  { %v927_v9 = vmul.f32 %v1560_v42, %v926_v28 }
 0xc6b   :  { %v928_v4 = vadd.f32 %v1560_v42, %v927_v9 }
 0xc6d   :  { %v932_v29 = vsel %vm931_vm0, %v1560_v42, %v928_v4 }
 0xc6e   :  { %v937_v31 = vsel %vm934_vm2, %v936_v5, %v932_v29 }
 0xc6f   :  { %v939_v32 = vsel %vm1788_vm5, %v1562_v30, %v937_v31 }
 0xc70   :  { %945 = vrot.lane.b32.xlu0 %v939_v32, %s1671_s3  ;;  %v943_v48 = vmul.f32 %v941_v8, %v939_v32 }
 0xc82   :  { %v828_v7 = vpop.f32.mrf.mxu3 }
 0xc83   :  { %v854_v58 = vadd.f32 %v853_v33, %v828_v7 }
 0xc85   :  { %v856_v35 = vadd.f32 %v1860_v52, %v854_v58 }
 0xc87   :  { %v1456_v45 = vmul.f32 -1.442695, %v856_v35 }
 0xc89   :  { %1563 = vpow2.f32 %v1456_v45 }
 0xc8f   :  { %v1564_v46 = vpop.eup %1563 }
 0xc90   :  { %v861_v47 = vadd.f32 1.0, %v1564_v46 }
 0xc92   :  { %1565 = vrcp.f32 %v861_v47  ;;  %v873_v51 = vand.u32 2147483648, %v861_v47  ;;  %v871_v54 = vand.u32 2147483647, %v861_v47  ;;  %vm867_vm3 = vweird.f32 %v861_v47 }
 0xc93   :  { %1567 = vtanh.f32 %v856_v35 }
 0xc94   :  { %v874_v56 = vor.u32 1.1754944e-38, %v873_v51  ;;  %vm872_vm6 = vcmp.eq.f32.partialorder %v871_v54, 8.507059e+37 }
 0xc98   :  { %v1566_v49 = vpop.eup %1565 }
 0xc99   :  { %v863_v50 = vmul.f32 %v1566_v49, %v861_v47  ;;  %vm868_vm1 = vweird.f32 %v1566_v49  ;;  %v1568_v60 = vpop.eup %1567 }
 0xc9a   :  { %vm869_vm4 = vmor %vm867_vm3, %vm868_vm1 }
 0xc9b   :  { %v864_v34 = vsub.f32 1.0, %v863_v50 }
 0xc9d   :  { %v865_v53 = vmul.f32 %v1566_v49, %v864_v34 }
 0xc9f   :  { %v866_v55 = vadd.f32 %v1566_v49, %v865_v53 }
 0xca1   :  { %v870_v59 = vsel %vm869_vm4, %v1566_v49, %v866_v55 }
 0xca2   :  { %v875_v61 = vsel %vm872_vm6, %v874_v56, %v870_v59 }
 0xca3   :  { %v877_v63 = vsel %vm1788_vm5, %v1568_v60, %v875_v61 }
 0xca4   :  { %880 = vrot.lane.b32.xlu1 %v877_v63, %s1671_s3  ;;  %v878_v57 = vmul.f32 %v877_v63, %v1997_v21 }
 0xce2   :  { %v946_v44 = vpop.permute.xlu0 %945 }
 0xce3   :  { %v948_v2 = vmul.f32 %v946_v44, %v939_v32 }
 0xce5   :  { %950 = vrot.lane.b32.xlu2 %v948_v2, %s1672_s20 }
 0xd16   :  { %v881_v3 = vpop.permute.xlu1 %880 }
 0xd17   :  { %v883_v6 = vmul.f32 %v881_v3, %v877_v63 }
 0xd19   :  { %885 = vrot.lane.b32.xlu0 %v883_v6, %s1672_s20 }
 0xd3f   :  { %v951_v11 = vpop.permute.xlu2 %950 }
 0xd40   :  { %v2029_v13 = vadd.f32 %v951_v11, %v943_v48 }
 0xd42   :  { %1569 = vtanh.f32 %v2029_v13 }
 0xd48   :  { %v1570_v14 = vpop.eup %1569 }
 0xd49   :  { %956 = vrot.lane.b32.xlu1 %v1570_v14, %s1671_s3 }
 0xd8b   :  { %v886_v15 = vpop.permute.xlu0 %885 }
 0xd8c   :  { %v2034_v16 = vadd.f32 %v886_v15, %v878_v57 }
 0xd8e   :  { %1571 = vtanh.f32 %v2034_v16 }
 0xd94   :  { %v1572_v18 = vpop.eup %1571 }
 0xd95   :  { %891 = vrot.lane.b32.xlu2 %v1572_v18, %s1671_s3 }
 0xdbb   :  { %v957_v17 = vpop.permute.xlu1 %956 }
 0xdbc   :  { %v959_v62 = vmul.f32 %v957_v17, %v939_v32 }
 0xdbe   :  { %v986_v19 = vrot.slane %v959_v62, 2 }
 0xdc0   :  { %987 = vrot.lane.b32.xlu0 %v986_v19, %s1672_s20 }
 0xdef   :  { %v892_v22 = vpop.permute.xlu2 %891 }
 0xdf0   :  { %v894_v10 = vmul.f32 %v892_v22, %v877_v63  ;;  %v1096_v63 = vrot.slane %v2029_v13, 6 }
 0xdf2   :  { %961 = vrot.lane.b32.xlu1 %v894_v10, %s1672_s20 }
 0xe32   :  { %v988_v24 = vpop.permute.xlu0 %987 }
 0xe33   :  { %1460 = vmatmul.msk.f32.vlgmr.msra.gmra.mxu3 %vm129_vm9, %v988_v24  ;;  %1462 = vmatmul.msk.f32.vlgmr.msra.gmra.mxu0 %vm129_vm9, %v988_v24 }
 0xe64   :  { %v962_v21 = vpop.permute.xlu1 %961 }
 0xe65   :  { %1459 = vmatmul.msk.f32.vlgmr.msra.gmra.mxu2 %vm129_vm9, %v962_v21 }
 0xeb0   :  { %v1067_v25 = vpop.f32.mrf.mxu0 }
 0xeb1   :  { %v1071_v26 = vrot.slane %v1067_v25, 4 }
 0xeb3   :  { %v1073_v27 = vadd.f32 %v1071_v26, %v1979_v20 }
 0xeb5   :  { %v1463_v12 = vmul.f32 -1.442695, %v1073_v27 }
 0xeb6   :  { %v1008_v29 = vpop.f32.mrf.mxu3 }
 0xeb7   :  { %1573 = vpow2.f32 %v1463_v12 }
 0xebd   :  { %v1574_v36 = vpop.eup %1573 }
 0xebe   :  { %v1078_v37 = vadd.f32 1.0, %v1574_v36 }
 0xec0   :  { %1575 = vrcp.f32 %v1078_v37  ;;  %v1090_v41 = vand.u32 2147483648, %v1078_v37  ;;  %v1088_v43 = vand.u32 2147483647, %v1078_v37  ;;  %vm1084_vm8 = vweird.f32 %v1078_v37 }
 0xec1   :  { %1577 = vtanh.f32 %v1073_v27 }
 0xec2   :  { %v1091_v0 = vor.u32 1.1754944e-38, %v1090_v41  ;;  %vm1089_vm11 = vcmp.eq.f32.partialorder %v1088_v43, 8.507059e+37 }
 0xec6   :  { %v1576_v38 = vpop.eup %1575 }
 0xec7   :  { %v1080_v39 = vmul.f32 %v1576_v38, %v1078_v37  ;;  %vm1085_vm7 = vweird.f32 %v1576_v38  ;;  %v1578_v1 = vpop.eup %1577 }
 0xec8   :  { %vm1086_vm10 = vmor %vm1084_vm8, %vm1085_vm7 }
 0xec9   :  { %v1081_v40 = vsub.f32 1.0, %v1080_v39 }
 0xecb   :  { %v1082_v42 = vmul.f32 %v1576_v38, %v1081_v40 }
 0xecd   :  { %v1083_v28 = vadd.f32 %v1576_v38, %v1082_v42 }
 0xecf   :  { %v1087_v9 = vsel %vm1086_vm10, %v1576_v38, %v1083_v28 }
 0xed0   :  { %v1092_v4 = vsel %vm1089_vm11, %v1091_v0, %v1087_v9 }
 0xed1   :  { %v1094_v5 = vsel %vm1788_vm5, %v1578_v1, %v1092_v4  ;;  %v1613_v1 = vld [vmem:[%s2128_s6] ss:$0 sm:$0xff] }
 0xed2   :  { %1100 = vrot.lane.b32.xlu2 %v1094_v5, %s1671_s3  ;;  %v1098_v44 = vmul.f32 %v1096_v63, %v1094_v5 }
 0xee8   :  { %v982_v30 = vpop.f32.mrf.mxu2 }
 0xee9   :  { %v1009_v31 = vadd.f32 %v1008_v29, %v982_v30 }
 0xeeb   :  { %v1011_v32 = vadd.f32 %v1860_v52, %v1009_v31 }
 0xeed   :  { %v1461_v33 = vmul.f32 -1.442695, %v1011_v32 }
 0xeef   :  { %1579 = vpow2.f32 %v1461_v33 }
 0xef5   :  { %v1580_v7 = vpop.eup %1579 }
 0xef6   :  { %v1016_v58 = vadd.f32 1.0, %v1580_v7 }
 0xef8   :  { %1581 = vrcp.f32 %v1016_v58  ;;  %v1028_v47 = vand.u32 2147483648, %v1016_v58  ;;  %v1026_v50 = vand.u32 2147483647, %v1016_v58  ;;  %vm1022_vm13 = vweird.f32 %v1016_v58 }
 0xef9   :  { %1583 = vtanh.f32 %v1011_v32 }
 0xefa   :  { %v1029_v51 = vor.u32 1.1754944e-38, %v1028_v47  ;;  %vm1027_vm15 = vcmp.eq.f32.partialorder %v1026_v50, 8.507059e+37 }
 0xefe   :  { %v1582_v35 = vpop.eup %1581 }
 0xeff   :  { %v1018_v45 = vmul.f32 %v1582_v35, %v1016_v58  ;;  %vm1023_vm12 = vweird.f32 %v1582_v35  ;;  %v1584_v52 = vpop.eup %1583 }
 0xf00   :  { %vm1024_vm14 = vmor %vm1022_vm13, %vm1023_vm12 }
 0xf01   :  { %v1019_v46 = vsub.f32 1.0, %v1018_v45 }
 0xf03   :  { %v1020_v49 = vmul.f32 %v1582_v35, %v1019_v46 }
 0xf05   :  { %v1021_v34 = vadd.f32 %v1582_v35, %v1020_v49 }
 0xf07   :  { %v1025_v53 = vsel %vm1024_vm14, %v1582_v35, %v1021_v34  ;;  %vm1423_vm14 = vcmask 41984  }
 0xf08   :  { %v1030_v54 = vsel %vm1027_vm15, %v1029_v51, %v1025_v53 }
 0xf09   :  { %v1032_v55 = vsel %vm1788_vm5, %v1584_v52, %v1030_v54 }
 0xf0a   :  { %1035 = vrot.lane.b32.xlu0 %v1032_v55, %s1671_s3  ;;  %v1033_v8 = vmul.f32 %v1032_v55, %v2034_v16 }
 0xf2c   :  { %v1101_v56 = vpop.permute.xlu2 %1100 }
 0xf2d   :  { %v1103_v59 = vmul.f32 %v1101_v56, %v1094_v5 }
 0xf2f   :  { %1105 = vrot.lane.b32.xlu1 %v1103_v59, %s1672_s20 }
 0xf7c   :  { %v1036_v60 = vpop.permute.xlu0 %1035 }
 0xf7d   :  { %v1038_v61 = vmul.f32 %v1036_v60, %v1032_v55 }
 0xf7f   :  { %1040 = vrot.lane.b32.xlu2 %v1038_v61, %s1672_s20 }
 0xfa1   :  { %v1106_v2 = vpop.permute.xlu1 %1105 }
 0xfa2   :  { %v2054_v3 = vadd.f32 %v1106_v2, %v1098_v44 }
 0xfa4   :  { %1585 = vtanh.f32 %v2054_v3 }
 0xfaa   :  { %v1586_v6 = vpop.eup %1585 }
 0xfab   :  { %1111 = vrot.lane.b32.xlu0 %v1586_v6, %s1671_s3 }
 0xfd9   :  { %v1041_v48 = vpop.permute.xlu2 %1040 }
 0xfda   :  { %v2059_v11 = vadd.f32 %v1041_v48, %v1033_v8 }
 0xfdc   :  { %1587 = vtanh.f32 %v2059_v11 }
 0xfe2   :  { %v1588_v14 = vpop.eup %1587 }
 0xfe3   :  { %1046 = vrot.lane.b32.xlu1 %v1588_v14, %s1671_s3 }
0x101d   :  { %v1112_v13 = vpop.permute.xlu0 %1111 }
0x101e   :  { %v1114_v57 = vmul.f32 %v1112_v13, %v1094_v5 }
0x1020   :  { %v1141_v15 = vrot.slane %v1114_v57, 4 }
0x1022   :  { %1142 = vrot.lane.b32.xlu2 %v1141_v15, %s1672_s20 }
0x1055   :  { %v1047_v18 = vpop.permute.xlu1 %1046 }
0x1056   :  { %v1049_v17 = vmul.f32 %v1047_v18, %v1032_v55  ;;  %v1251_v55 = vrot.slane %v2054_v3, 6 }
0x1058   :  { %1116 = vrot.lane.b32.xlu0 %v1049_v17, %s1672_s20 }
0x107c   :  { %v1143_v62 = vpop.permute.xlu2 %1142 }
0x107d   :  { %1465 = vmatmul.msk.f32.vlgmr.msrb.gmra.mxu2 %vm129_vm9, %v1143_v62  ;;  %1467 = vmatmul.msk.f32.vlgmr.msrb.gmra.mxu3 %vm129_vm9, %v1143_v62 }
0x10ca   :  { %v1117_v16 = vpop.permute.xlu0 %1116 }
0x10cb   :  { %1464 = vmatmul.msk.f32.vlgmr.msrb.gmra.mxu1 %vm129_vm9, %v1117_v16 }
0x1100   :  { %v1222_v19 = vpop.f32.mrf.mxu3  ;;  %v1163_v28 = vpop.f32.mrf.mxu2 }
0x1101   :  { %v1226_v22 = vrot.slane %v1222_v19, 2 }
0x1103   :  { %v1228_v10 = vadd.f32 %v1226_v22, %v1979_v20 }
0x1105   :  { %v1468_v24 = vmul.f32 -1.442695, %v1228_v10 }
0x1107   :  { %1589 = vpow2.f32 %v1468_v24 }
0x110d   :  { %v1590_v21 = vpop.eup %1589 }
0x110e   :  { %v1233_v25 = vadd.f32 1.0, %v1590_v21 }
0x1110   :  { %1591 = vrcp.f32 %v1233_v25  ;;  %v1245_v36 = vand.u32 2147483648, %v1233_v25  ;;  %v1243_v38 = vand.u32 2147483647, %v1233_v25  ;;  %vm1239_vm2 = vweird.f32 %v1233_v25 }
0x1111   :  { %1593 = vtanh.f32 %v1228_v10 }
0x1112   :  { %v1246_v40 = vor.u32 1.1754944e-38, %v1245_v36  ;;  %vm1244_vm3 = vcmp.eq.f32.partialorder %v1243_v38, 8.507059e+37 }
0x1116   :  { %v1592_v26 = vpop.eup %1591 }
0x1117   :  { %v1235_v27 = vmul.f32 %v1592_v26, %v1233_v25  ;;  %vm1240_vm0 = vweird.f32 %v1592_v26  ;;  %v1594_v20 = vpop.eup %1593 }
0x1118   :  { %vm1241_vm1 = vmor %vm1239_vm2, %vm1240_vm0 }
0x1119   :  { %v1236_v12 = vsub.f32 1.0, %v1235_v27 }
0x111b   :  { %v1237_v37 = vmul.f32 %v1592_v26, %v1236_v12 }
0x111d   :  { %v1238_v39 = vadd.f32 %v1592_v26, %v1237_v37 }
0x111f   :  { %v1242_v41 = vsel %vm1241_vm1, %v1592_v26, %v1238_v39 }
0x1120   :  { %v1247_v42 = vsel %vm1244_vm3, %v1246_v40, %v1242_v41 }
0x1121   :  { %v1249_v43 = vsel %vm1788_vm5, %v1594_v20, %v1247_v42 }
0x1122   :  { %1255 = vrot.lane.b32.xlu1 %v1249_v43, %s1671_s3  ;;  %v1253_v56 = vmul.f32 %v1251_v55, %v1249_v43 }
0x1148   :  { %v1137_v0 = vpop.f32.mrf.mxu1 }
0x1149   :  { %v1164_v9 = vadd.f32 %v1163_v28, %v1137_v0 }
0x114b   :  { %v1166_v4 = vadd.f32 %v1613_v1, %v1164_v9  ;;  %v1363_v9 = vld [vmem:[%s2129_s7 + $0x18] sm:$0xff] }
0x114c   :  { %1385 = vmatpush.msra.mxu2 %v1363_v9 }
0x114d   :  { %v1466_v5 = vmul.f32 -1.442695, %v1166_v4 }
0x114e   :  { %1386 = vmatpush.msra.mxu2 %v1362_v23 }
0x114f   :  { %1595 = vpow2.f32 %v1466_v5 }
0x1155   :  { %v1596_v29 = vpop.eup %1595 }
0x1156   :  { %v1171_v30 = vadd.f32 1.0, %v1596_v29 }
0x1158   :  { %1597 = vrcp.f32 %v1171_v30  ;;  %v1183_v7 = vand.u32 2147483648, %v1171_v30  ;;  %v1181_v35 = vand.u32 2147483647, %v1171_v30  ;;  %vm1177_vm6 = vweird.f32 %v1171_v30 }
0x1159   :  { %1599 = vtanh.f32 %v1166_v4  ;;  %v1360_v4 = vld [vmem:[%s2129_s7] sm:$0xff] }
0x115a   :  { %v1184_v46 = vor.u32 1.1754944e-38, %v1183_v7  ;;  %vm1182_vm8 = vcmp.eq.f32.partialorder %v1181_v35, 8.507059e+37  ;;  %v1484_v35 = vld [vmem:[%s2132_s10] ss:$0 sm:$0xff] }
0x115e   :  { %v1598_v31 = vpop.eup %1597 }
0x115f   :  { %v1173_v32 = vmul.f32 %v1598_v31, %v1171_v30  ;;  %vm1178_vm4 = vweird.f32 %v1598_v31  ;;  %v1600_v49 = vpop.eup %1599  ;;  %v1394_v30 = vld [vmem:[%s2131_s9 + $0x8] sm:$0xff] }
0x1160   :  { %vm1179_vm7 = vmor %vm1177_vm6, %vm1178_vm4  ;;  %1417 = vmatpush.msra.mxu3 %v1394_v30 }
0x1161   :  { %v1174_v33 = vsub.f32 1.0, %v1173_v32 }
0x1163   :  { %v1175_v58 = vmul.f32 %v1598_v31, %v1174_v33  ;;  %v1483_v33 = vld [vmem:[%s2130_s8] ss:$0 sm:$0xff] }
0x1165   :  { %v1176_v45 = vadd.f32 %v1598_v31, %v1175_v58 }
0x1167   :  { %v1180_v47 = vsel %vm1179_vm7, %v1598_v31, %v1176_v45  ;;  %v1393_v31 = vld [vmem:[%s2131_s9] sm:$0xff] }
0x1168   :  { %v1185_v50 = vsel %vm1182_vm8, %v1184_v46, %v1180_v47  ;;  %1418 = vmatpush.msra.mxu3 %v1393_v31 }
0x1169   :  { %v1187_v34 = vsel %vm1788_vm5, %v1600_v49, %v1185_v50 }
0x116a   :  { %1190 = vrot.lane.b32.xlu2 %v1187_v34, %s1671_s3  ;;  %v1188_v63 = vmul.f32 %v1187_v34, %v2059_v11 }
0x1194   :  { %v1256_v51 = vpop.permute.xlu1 %1255 }
0x1195   :  { %v1258_v53 = vmul.f32 %v1256_v51, %v1249_v43 }
0x1197   :  { %1260 = vrot.lane.b32.xlu0 %v1258_v53, %s1672_s20 }
0x11c4   :  { %v1191_v52 = vpop.permute.xlu2 %1190 }
0x11c5   :  { %v1193_v54 = vmul.f32 %v1191_v52, %v1187_v34 }
0x11c7   :  { %1195 = vrot.lane.b32.xlu1 %v1193_v54, %s1672_s20 }
0x1209   :  { %v1261_v59 = vpop.permute.xlu0 %1260 }
0x120a   :  { %v1263_v60 = vadd.f32 %v1261_v59, %v1253_v56 }
0x120c   :  { %1601 = vtanh.f32 %v1263_v60 }
0x1212   :  { %v1602_v61 = vpop.eup %1601 }
0x1213   :  { %1266 = vrot.lane.b32.xlu2 %v1602_v61, %s1671_s3 }
0x1239   :  { %v1196_v44 = vpop.permute.xlu1 %1195 }
0x123a   :  { %v1198_v2 = vadd.f32 %v1196_v44, %v1188_v63 }
0x123c   :  { %1603 = vtanh.f32 %v1198_v2 }
0x1242   :  { %v1604_v6 = vpop.eup %1603 }
0x1243   :  { %1201 = vrot.lane.b32.xlu0 %v1604_v6, %s1671_s3 }
0x126d   :  { %v1267_v8 = vpop.permute.xlu2 %1266 }
0x126e   :  { %v1269_v48 = vmul.f32 %v1267_v8, %v1249_v43 }
0x1270   :  { %v1296_v14 = vrot.slane %v1269_v48, 6 }
0x1272   :  { %1297 = vrot.lane.b32.xlu2 %v1296_v14, %s1672_s20 }
0x12b5   :  { %v1202_v3 = vpop.permute.xlu0 %1201 }
0x12b6   :  { %v1204_v13 = vmul.f32 %v1202_v3, %v1187_v34 }
0x12b8   :  { %1271 = vrot.lane.b32.xlu1 %v1204_v13, %s1672_s20 }
0x12cc   :  { %v1298_v57 = vpop.permute.xlu2 %1297 }
0x12cd   :  { %1470 = vmatmul.msk.f32.vlgmr.msra.gmra.mxu1 %vm129_vm9, %v1298_v57 }
0x132a   :  { %v1272_v15 = vpop.permute.xlu1 %1271 }
0x132b   :  { %1469 = vmatmul.msk.f32.vlgmr.msrb.gmra.mxu0 %vm129_vm9, %v1272_v15 }
0x134a   :  { %v1318_v11 = vpop.f32.mrf.mxu1 }
0x13a8   :  { %v1292_v18 = vpop.f32.mrf.mxu0 }
0x13a9   :  { %v1319_v17 = vadd.f32 %v1318_v11, %v1292_v18 }
0x13ab   :  { %v1321_v62 = vadd.f32 %v1613_v1, %v1319_v17  ;;  %v1361_v1 = vld [vmem:[%s2129_s7 + $0x8] sm:$0xff] }
0x13ac   :  { %1387 = vmatpush.msra.mxu2 %v1361_v1 }
0x13ad   :  { %v1471_v16 = vmul.f32 -1.442695, %v1321_v62 }
0x13ae   :  { %1388 = vmatpush.msra.mxu2 %v1360_v4 }
0x13af   :  { %1605 = vpow2.f32 %v1471_v16 }
0x13b5   :  { %v1606_v19 = vpop.eup %1605 }
0x13b6   :  { %v1326_v22 = vadd.f32 1.0, %v1606_v19 }
0x13b8   :  { %1607 = vrcp.f32 %v1326_v22  ;;  %v1338_v25 = vand.u32 2147483648, %v1326_v22  ;;  %v1336_v27 = vand.u32 2147483647, %v1326_v22  ;;  %vm1332_vm11 = vweird.f32 %v1326_v22 }
0x13b9   :  { %1609 = vtanh.f32 %v1321_v62 }
0x13ba   :  { %v1339_v36 = vor.u32 1.1754944e-38, %v1338_v25  ;;  %vm1337_vm13 = vcmp.eq.f32.partialorder %v1336_v27, 8.507059e+37 }
0x13be   :  { %v1608_v10 = vpop.eup %1607 }
0x13bf   :  { %v1328_v24 = vmul.f32 %v1608_v10, %v1326_v22  ;;  %vm1333_vm10 = vweird.f32 %v1608_v10  ;;  %v1610_v38 = vpop.eup %1609 }
0x13c0   :  { %vm1334_vm12 = vmor %vm1332_vm11, %vm1333_vm10 }
0x13c1   :  { %v1329_v21 = vsub.f32 1.0, %v1328_v24 }
0x13c3   :  { %v1330_v26 = vmul.f32 %v1608_v10, %v1329_v21 }
0x13c5   :  { %v1331_v12 = vadd.f32 %v1608_v10, %v1330_v26 }
0x13c7   :  { %v1335_v37 = vsel %vm1334_vm12, %v1608_v10, %v1331_v12 }
0x13c8   :  { %v1340_v39 = vsel %vm1337_vm13, %v1339_v36, %v1335_v37 }
0x13c9   :  { %v1342_v40 = vsel %vm1788_vm5, %v1610_v38, %v1340_v39  ;;  %vm1399_vm5 = vcmask 130048  }
0x13ca   :  { %1345 = vrot.lane.b32.xlu0 %v1342_v40, %s1671_s3  ;;  %v1343_v42 = vmul.f32 %v1342_v40, %v1198_v2 }
0x143c   :  { %v1346_v41 = vpop.permute.xlu0 %1345 }
0x143d   :  { %v1348_v20 = vmul.f32 %v1346_v41, %v1342_v40 }
0x143f   :  { %1350 = vrot.lane.b32.xlu1 %v1348_v20, %s1672_s20 }
0x14b1   :  { %v1351_v43 = vpop.permute.xlu1 %1350 }
0x14b2   :  { %v1353_v28 = vadd.f32 %v1351_v43, %v1343_v42 }
0x14b4   :  { %1611 = vtanh.f32 %v1353_v28 }
0x14ba   :  { %v1612_v0 = vpop.eup %1611 }
0x14bb   :  { %1356 = vrot.lane.b32.xlu2 %v1612_v0, %s1671_s3 }
0x1515   :  { %v1357_v5 = vpop.permute.xlu2 %1356 }
0x1516   :  { %v1359_v29 = vmul.f32 %v1357_v5, %v1342_v40 }
0x1518   :  { %1369 = vrot.lane.b32.xlu0 %v1359_v29, %s1672_s20 }
0x158a   :  { %v1370_v32 = vpop.permute.xlu0 %1369 }
0x158b   :  { %1472 = vmatmul.msk.f32.vlgmr.msra.gmra.mxu2 %vm129_vm9, %v1370_v32 }
0x160e   :  { %v1390_v7 = vpop.f32.mrf.mxu2 }
0x160f   :  { %v1391_v58 = vadd.f32 %v1483_v33, %v1390_v7 }
0x1611   :  { %1473 = vmatmul.msk.f32.vlgmr.msra.gmra.mxu3 %vm1399_vm5, %v1391_v58 }
0x1694   :  { %v1420_v45 = vpop.f32.mrf.mxu3 }
0x1695   :  { %v1421_v46 = vadd.f32 %v1484_v35, %v1420_v45 }
0x1697   :  { %1424 = vst.msk [vmem:[%s2133_s11] sm:$0x3] %vm1423_vm14, %v1421_v46 }
0x1698   :  { %1429 = vsyncpa [#allocation3], 1 }
0x1699   :  { %1430 = vsyncpa [#allocation5], 1 }

</bundles_post_ra>
